<compile_context>
chip_gen: v5e
topology: v5e:2x2
jax: 0.10.0
libtpu: 0.0.40
codegen_flags: <defaults>
</compile_context>

<pallas_src>
import functools

import jax
import jax.numpy as jnp
from jax.experimental import pallas as pl
from jax.experimental.pallas import tpu as pltpu

_EPS = 1e-5


# ----------------------------------------------------------------------------
# Pallas kernels (all activations in transposed (C, M) layout: M on lanes)
# ----------------------------------------------------------------------------

def _conv_bn_relu_kernel(col_ref, w_ref, g_ref, b_ref, o_ref):
    """o = relu(BN(W @ col));  col: (K, M), W: (Cout, K), gamma/beta: (Cout, 1)."""
    y = jnp.dot(w_ref[...], col_ref[...], preferred_element_type=jnp.float32)  # (C, M)
    mean = jnp.mean(y, axis=1, keepdims=True)                                  # lane reduce
    var = jnp.mean((y - mean) ** 2, axis=1, keepdims=True)                     # biased var
    scale = g_ref[...] * jax.lax.rsqrt(var + _EPS)                             # EUP rsqrt
    shift = b_ref[...] - mean * scale
    o_ref[...] = jnp.maximum(y * scale + shift, 0.0)


def _enc2_vq_kernel(col_ref, w_ref, g_ref, b_ref, prew_ref, preb_ref,
                    emb_ref, embT_ref, esq_ref, postw_ref, postb_ref,
                    z_ref, loss_ref, *, beta):
    """Fused: enc conv2 + BN + ReLU + pre 1x1 conv + vector-quantize + post 1x1 conv."""
    # ---- conv2 + BN + ReLU (bias absorbed by BN) ----
    y = jnp.dot(w_ref[...], col_ref[...], preferred_element_type=jnp.float32)  # (C2, M)
    mean = jnp.mean(y, axis=1, keepdims=True)
    var = jnp.mean((y - mean) ** 2, axis=1, keepdims=True)
    scale = g_ref[...] * jax.lax.rsqrt(var + _EPS)
    y = jnp.maximum(y * scale + (b_ref[...] - mean * scale), 0.0)

    # ---- pre-quant 1x1 conv ----
    q = jnp.dot(prew_ref[...], y, preferred_element_type=jnp.float32) + preb_ref[...]  # (D, M)
    d_dim, m_dim = q.shape
    n_emb = emb_ref.shape[0]

    # ---- nearest codebook entry (MXU distances; ||q||^2 dropped: constant per column) ----
    dist = esq_ref[...] - 2.0 * jnp.dot(emb_ref[...], q,
                                        preferred_element_type=jnp.float32)   # (nE, M)
    min_d = jnp.min(dist, axis=0, keepdims=True)                              # (1, M)
    iota = jax.lax.broadcasted_iota(jnp.int32, dist.shape, 0).astype(jnp.float32)
    cand = jnp.where(dist == min_d, iota, jnp.float32(n_emb))
    sel = jnp.min(cand, axis=0, keepdims=True)          # first index achieving the min (torch tie rule)
    onehot = (iota == sel).astype(jnp.float32)                                # (nE, M)

    # ---- gather via one-hot matmul (straight-through forward value) ----
    quant = jnp.dot(embT_ref[...], onehot, preferred_element_type=jnp.float32)  # (D, M)

    # ---- quantize_loss = codebook + beta*commitment = (1+beta)*MSE (forward value) ----
    diff2 = (quant - q) ** 2
    s = jnp.sum(jnp.sum(diff2, axis=1, keepdims=True), axis=0, keepdims=True)  # (1, 1)
    loss_ref[...] = (1.0 + beta) * s / jnp.float32(m_dim * d_dim)

    # ---- post-quant 1x1 conv ----
    z_ref[...] = jnp.dot(postw_ref[...], quant,
                         preferred_element_type=jnp.float32) + postb_ref[...]


def _convt_bn_relu_kernel(a_ref, w_ref, g_ref, b_ref, o_ref, *, n_phase):
    """Phase-decomposed ConvTranspose + BN + ReLU.  a: (P, K, M), w: (P, Cout, K)."""
    ys = [jnp.dot(w_ref[p], a_ref[p], preferred_element_type=jnp.float32)
          for p in range(n_phase)]
    y = jnp.concatenate(ys, axis=1)                 # (Cout, P*M) — lane-dense slab
    mean = jnp.mean(y, axis=1, keepdims=True)       # BN stats over all phases/positions
    var = jnp.mean((y - mean) ** 2, axis=1, keepdims=True)
    scale = g_ref[...] * jax.lax.rsqrt(var + _EPS)
    o_ref[...] = jnp.maximum(y * scale + (b_ref[...] - mean * scale), 0.0)


def _convt_bias_tanh_kernel(a_ref, w_ref, b_ref, o_ref, *, n_phase):
    """Phase-decomposed ConvTranspose + bias + Tanh, all phases in one invocation."""
    ys = [jnp.dot(w_ref[p], a_ref[p], preferred_element_type=jnp.float32)
          for p in range(n_phase)]
    y = jnp.concatenate(ys, axis=1) + b_ref[...]    # (Cout, P*M) — one lane-dense store
    o_ref[...] = jnp.tanh(y)


# ----------------------------------------------------------------------------
# pallas_call wrappers
# ----------------------------------------------------------------------------

def conv_bn_relu(colT, wT, gamma, beta_):
    K, M = colT.shape
    Cout = wT.shape[0]
    return pl.pallas_call(
        _conv_bn_relu_kernel,
        grid=(1,),
        in_specs=[
            pl.BlockSpec((K, M), lambda i: (0, 0)),
            pl.BlockSpec((Cout, K), lambda i: (0, 0)),
            pl.BlockSpec((Cout, 1), lambda i: (0, 0)),
            pl.BlockSpec((Cout, 1), lambda i: (0, 0)),
        ],
        out_specs=pl.BlockSpec((Cout, M), lambda i: (0, 0)),
        out_shape=jax.ShapeDtypeStruct((Cout, M), jnp.float32),
    )(colT, wT, gamma, beta_)


def enc2_vq(colT, pp, beta=0.2):
    K, M = colT.shape
    C2 = pp["enc_w2"].shape[0]
    D = pp["emb"].shape[1]
    NE = pp["emb"].shape[0]
    Cz = pp["post_w"].shape[0]
    kern = functools.partial(_enc2_vq_kernel, beta=beta)
    z, loss = pl.pallas_call(
        kern,
        grid=(1,),
        in_specs=[
            pl.BlockSpec((K, M), lambda i: (0, 0)),
            pl.BlockSpec((C2, K), lambda i: (0, 0)),
            pl.BlockSpec((C2, 1), lambda i: (0, 0)),
            pl.BlockSpec((C2, 1), lambda i: (0, 0)),
            pl.BlockSpec((D, C2), lambda i: (0, 0)),
            pl.BlockSpec((D, 1), lambda i: (0, 0)),
            pl.BlockSpec((NE, D), lambda i: (0, 0)),
            pl.BlockSpec((D, NE), lambda i: (0, 0)),
            pl.BlockSpec((NE, 1), lambda i: (0, 0)),
            pl.BlockSpec((Cz, D), lambda i: (0, 0)),
            pl.BlockSpec((Cz, 1), lambda i: (0, 0)),
        ],
        out_specs=[
            pl.BlockSpec((Cz, M), lambda i: (0, 0)),
            pl.BlockSpec((1, 1), lambda i: (0, 0)),
        ],
        out_shape=(
            jax.ShapeDtypeStruct((Cz, M), jnp.float32),
            jax.ShapeDtypeStruct((1, 1), jnp.float32),
        ),
    )(colT, pp["enc_w2"], pp["enc_g2"], pp["enc_be2"],
      pp["pre_w"], pp["pre_b"], pp["emb"], pp["embT"], pp["emb_sq"],
      pp["post_w"], pp["post_b"])
    return z, loss


def convt_bn_relu(colsT, w_ph, gamma, beta_):
    NP, K, M = colsT.shape
    Cout = w_ph.shape[1]
    kern = functools.partial(_convt_bn_relu_kernel, n_phase=NP)
    return pl.pallas_call(
        kern,
        grid=(1,),
        in_specs=[
            pl.BlockSpec((NP, K, M), lambda i: (0, 0, 0)),
            pl.BlockSpec((NP, Cout, K), lambda i: (0, 0, 0)),
            pl.BlockSpec((Cout, 1), lambda i: (0, 0)),
            pl.BlockSpec((Cout, 1), lambda i: (0, 0)),
        ],
        out_specs=pl.BlockSpec((Cout, NP * M), lambda i: (0, 0)),
        out_shape=jax.ShapeDtypeStruct((Cout, NP * M), jnp.float32),
    )(colsT, w_ph, gamma, beta_)


def convt_bias_tanh(colsT, w_ph, bias):
    NP, K, M = colsT.shape
    Cout = w_ph.shape[1]
    kern = functools.partial(_convt_bias_tanh_kernel, n_phase=NP)
    return pl.pallas_call(
        kern,
        grid=(1,),
        in_specs=[
            pl.BlockSpec((NP, K, M), lambda i: (0, 0, 0)),
            pl.BlockSpec((NP, Cout, K), lambda i: (0, 0, 0)),
            pl.BlockSpec((Cout, 1), lambda i: (0, 0)),
        ],
        out_specs=pl.BlockSpec((Cout, NP * M), lambda i: (0, 0)),
        out_shape=jax.ShapeDtypeStruct((Cout, NP * M), jnp.float32),
    )(colsT, w_ph, bias)


# ----------------------------------------------------------------------------
# Layout glue (tiny XLA ops): im2col slabs already transposed to (K, M)
# ----------------------------------------------------------------------------

def conv_cols_T(x, k, stride, pad):
    """x: (B,H,W,C) NHWC -> im2col^T (k*k*C, B*OH*OW) with patch ordering (kh, kw, cin)."""
    B, H, W, C = x.shape
    xp = jnp.pad(x, ((0, 0), (pad, pad), (pad, pad), (0, 0)))
    OH = (H + 2 * pad - k) // stride + 1
    OW = (W + 2 * pad - k) // stride + 1
    pats = []
    for di in range(k):
        for dj in range(k):
            pats.append(xp[:, di:di + stride * OH:stride, dj:dj + stride * OW:stride, :])
    col = jnp.stack(pats, axis=3)                       # (B, OH, OW, k*k, C)
    col = col.reshape(B * OH * OW, k * k * C).T         # (K, M) — M on lanes in the kernel
    return col, (B, OH, OW)


def convt_phase_cols(x):
    """Phase im2col for ConvTranspose(k=4, s=2, p=1): x (B,H,W,C) -> (4, 4*C, B*H*W)."""
    B, H, W, C = x.shape
    xp = jnp.pad(x, ((0, 0), (1, 1), (1, 1), (0, 0)))
    cols = []
    for a in range(2):
        for b in range(2):
            pats = []
            for r in range(2):
                for c in range(2):
                    pats.append(xp[:, a + r:a + r + H, b + c:b + c + W, :])
            col = jnp.stack(pats, axis=3)               # (B, H, W, 4, C), patch order r*2+c
            cols.append(col.reshape(B * H * W, 4 * C).T)
    return jnp.stack(cols, axis=0)                      # (4, 4C, B*H*W), phase order a*2+b


# ----------------------------------------------------------------------------
# One-time parameter preparation (outside the jitted hot path)
# ----------------------------------------------------------------------------

def prepare_params(p):
    def conv_wT(w):                      # (cout, cin, k, k) -> (cout, k*k*cin), (kh, kw, cin) order
        return jnp.transpose(w, (0, 2, 3, 1)).reshape(w.shape[0], -1).astype(jnp.float32)

    def convt_phase_w(w_t):              # (cin, cout, 4, 4) -> (4, cout, 2*2*cin)
        cin, cout, k, _ = w_t.shape
        phases = []
        for a in range(2):
            for b in range(2):
                taps = []
                for r in range(2):
                    for c in range(2):
                        taps.append(jnp.transpose(
                            w_t[:, :, (k - 1) - (a + 2 * r), (k - 1) - (b + 2 * c)], (1, 0)))
                sub = jnp.stack(taps, axis=1)            # (cout, 4, cin), patch order r*2+c
                phases.append(sub.reshape(cout, 4 * cin))
        return jnp.stack(phases, axis=0).astype(jnp.float32)

    col = lambda v: v.reshape(-1, 1).astype(jnp.float32)
    emb = p["emb"].astype(jnp.float32)
    # Note: enc_b1 / enc_b2 / dec_b1 are dropped — a per-channel bias before BatchNorm is
    # cancelled exactly by the batch-mean subtraction, so the forward output is unchanged.
    return {
        "enc_w1": conv_wT(p["enc_w1"]), "enc_g1": col(p["enc_g1"]), "enc_be1": col(p["enc_be1"]),
        "enc_w2": conv_wT(p["enc_w2"]), "enc_g2": col(p["enc_g2"]), "enc_be2": col(p["enc_be2"]),
        "pre_w": p["pre_w"].reshape(p["pre_w"].shape[0], p["pre_w"].shape[1]).astype(jnp.float32),
        "pre_b": col(p["pre_b"]),
        "emb": emb, "embT": emb.T,
        "emb_sq": jnp.sum(emb * emb, axis=1, keepdims=True),
        "post_w": p["post_w"].reshape(p["post_w"].shape[0], p["post_w"].shape[1]).astype(jnp.float32),
        "post_b": col(p["post_b"]),
        "dec_w1": convt_phase_w(p["dec_w1"]), "dec_g1": col(p["dec_g1"]), "dec_be1": col(p["dec_be1"]),
        "dec_w2": convt_phase_w(p["dec_w2"]), "dec_b2": col(p["dec_b2"]),
    }


# ----------------------------------------------------------------------------
# VQVAE forward (4 fused pallas_calls)
# ----------------------------------------------------------------------------

def vqvae_forward(x_nchw, pp):
    x = jnp.transpose(x_nchw, (0, 2, 3, 1)).astype(jnp.float32)    # NCHW -> NHWC

    # ---- Encoder layer 1: Conv(4->16,k4,s2,p1) + BN + ReLU ----
    col1, (B, H1, W1) = conv_cols_T(x, k=4, stride=2, pad=1)       # (64, B*H1*W1)
    y1 = conv_bn_relu(col1, pp["enc_w1"], pp["enc_g1"], pp["enc_be1"])   # (16, M1)
    C1 = y1.shape[0]
    y1 = y1.T.reshape(B, H1, W1, C1)

    # ---- Encoder layer 2 + VQ bottleneck (pre 1x1, codebook, post 1x1) ----
    col2, (B, H2, W2) = conv_cols_T(y1, k=4, stride=2, pad=1)      # (256, B*H2*W2)
    z_T, loss = enc2_vq(col2, pp, beta=0.2)                        # (4, M2), (1, 1)
    z = z_T.T.reshape(B, H2, W2, z_T.shape[0])                     # (B, 4, 4, 4) NHWC

    # ---- Decoder layer 1: ConvT(4->16,k4,s2,p1) + BN + ReLU (phase-decomposed) ----
    cols_d1 = convt_phase_cols(z)                                  # (4, 16, B*H2*W2)
    d1 = convt_bn_relu(cols_d1, pp["dec_w1"], pp["dec_g1"], pp["dec_be1"])  # (16, 4*M2)
    Cd1 = d1.shape[0]
    d1 = d1.reshape(Cd1, 2, 2, B, H2, W2)                          # [ch, a, b, B, m, n]
    d1 = jnp.transpose(d1, (3, 4, 1, 5, 2, 0)).reshape(B, 2 * H2, 2 * W2, Cd1)

    # ---- Decoder layer 2: ConvT(16->4,k4,s2,p1) + Tanh (phase-decomposed, single step) ----
    H3, W3 = d1.shape[1], d1.shape[2]
    cols_d2 = convt_phase_cols(d1)                                 # (4, 64, B*H3*W3)
    d2 = convt_bias_tanh(cols_d2, pp["dec_w2"], pp["dec_b2"])      # (4, 4*B*H3*W3)
    Cout = d2.shape[0]
    d2 = d2.reshape(Cout, 2, 2, B, H3, W3)                         # [ch, a, b, B, m, n]
    out = jnp.transpose(d2, (3, 0, 4, 1, 5, 2)).reshape(B, Cout, 2 * H3, 2 * W3)  # NCHW

    return out, loss[0, 0]


# ----------------------------------------------------------------------------
# Deterministic parameter init (shapes mirror the PyTorch module)
# ----------------------------------------------------------------------------

def init_params(key, in_size=4, out_size=4, hidden=4, enc_hidden=16, dec_hidden=16,
                vq_hidden=2, n_emb=3, emb_dim=2):
    ks = jax.random.split(key, 16)
    w = lambda k, shape, s=0.1: s * jax.random.normal(k, shape, jnp.float32)
    return {
        "enc_w1": w(ks[0], (enc_hidden, in_size, 4, 4)), "enc_b1": w(ks[1], (enc_hidden,)),
        "enc_g1": jnp.ones((enc_hidden,), jnp.float32), "enc_be1": jnp.zeros((enc_hidden,), jnp.float32),
        "enc_w2": w(ks[2], (hidden, enc_hidden, 4, 4)), "enc_b2": w(ks[3], (hidden,)),
        "enc_g2": jnp.ones((hidden,), jnp.float32), "enc_be2": jnp.zeros((hidden,), jnp.float32),
        "pre_w": w(ks[4], (vq_hidden, hidden, 1, 1)), "pre_b": w(ks[5], (vq_hidden,)),
        "emb": jax.random.normal(ks[6], (n_emb, emb_dim), jnp.float32),
        "post_w": w(ks[7], (hidden, vq_hidden, 1, 1)), "post_b": w(ks[8], (hidden,)),
        "dec_w1": w(ks[9], (hidden, dec_hidden, 4, 4)), "dec_b1": w(ks[10], (dec_hidden,)),
        "dec_g1": jnp.ones((dec_hidden,), jnp.float32), "dec_be1": jnp.zeros((dec_hidden,), jnp.float32),
        "dec_w2": w(ks[11], (dec_hidden, out_size, 4, 4)), "dec_b2": w(ks[12], (out_size,)),
    }


if __name__ == "__main__":
    key = jax.random.PRNGKey(0)
    k_x, k_p = jax.random.split(key)
    # VQVAE(in_size=4, out_size=4, hidden_size=4); input NCHW
    x = jax.random.normal(k_x, (2, 4, 16, 16), jnp.float32)
    params = init_params(k_p, in_size=4, out_size=4, hidden=4)
    prepped = prepare_params(params)            # one-time weight re-layout, outside the hot path

    fwd = jax.jit(vqvae_forward)
    out, loss = fwd(x, prepped)
    out = jax.block_until_ready(out)
    loss = jax.block_until_ready(loss)

    assert out.shape == (2, 4, 16, 16), out.shape
    assert loss.shape == (), loss.shape
    print("KERNEL_OK")
</pallas_src>

<mosaic_0001>
module attributes {stable_mosaic.version = 11 : i64} {
  func.func @_conv_bn_relu_kernel(%arg0: i32, %arg1: memref<64x128xf32, #tpu.memory_space<vmem>>, %arg2: memref<16x64xf32, #tpu.memory_space<vmem>>, %arg3: memref<16x1xf32, #tpu.memory_space<vmem>>, %arg4: memref<16x1xf32, #tpu.memory_space<vmem>>, %arg5: memref<16x128xf32, #tpu.memory_space<vmem>>) attributes {dimension_semantics = [#tpu.dimension_semantics<arbitrary>], iteration_bounds = array<i64: 1>, scalar_prefetch = 0 : i64, scratch_operands = 0 : i64, tpu.core_type = #tpu.core_type<tc>, window_params = [{pipeline_mode = #tpu.pipeline_mode<synchronous>, transform_indices = @transform_0, window_bounds = array<i64: 64, 128>}, {pipeline_mode = #tpu.pipeline_mode<synchronous>, transform_indices = @transform_1, window_bounds = array<i64: 16, 64>}, {pipeline_mode = #tpu.pipeline_mode<synchronous>, transform_indices = @transform_2, window_bounds = array<i64: 16, 1>}, {pipeline_mode = #tpu.pipeline_mode<synchronous>, transform_indices = @transform_3, window_bounds = array<i64: 16, 1>}, {pipeline_mode = #tpu.pipeline_mode<synchronous>, transform_indices = @transform_4, window_bounds = array<i64: 16, 128>}]} {
    %c0 = arith.constant 0 : index
    %c0_0 = arith.constant 0 : index
    %0 = vector.load %arg2[%c0, %c0_0] : memref<16x64xf32, #tpu.memory_space<vmem>>, vector<16x64xf32>
    %c0_1 = arith.constant 0 : index
    %c0_2 = arith.constant 0 : index
    %1 = vector.load %arg1[%c0_1, %c0_2] : memref<64x128xf32, #tpu.memory_space<vmem>>, vector<64x128xf32>
    %cst = arith.constant dense<0.000000e+00> : vector<16x128xf32>
    %2 = tpu.matmul %0, %1, %cst {dimension_numbers = #tpu.dot_dimension_numbers<[1], [0], [0], [1], [0, 0, 1, 1], [], []>} : vector<16x64xf32>, vector<64x128xf32>, vector<16x128xf32> -> vector<16x128xf32>
    %cst_3 = arith.constant dense<0.000000e+00> : vector<16xf32>
    %3 = vector.multi_reduction <add>, %2, %cst_3 [1] : vector<16x128xf32> to vector<16xf32>
    %4 = vector.shape_cast %3 : vector<16xf32> to vector<16x1xf32>
    %cst_4 = arith.constant 1.280000e+02 : f32
    %5 = vector.broadcast %cst_4 : f32 to vector<16x1xf32>
    %6 = arith.divf %4, %5 : vector<16x1xf32>
    %7 = vector.broadcast %6 : vector<16x1xf32> to vector<16x128xf32>
    %8 = arith.subf %2, %7 : vector<16x128xf32>
    %9 = arith.mulf %8, %8 : vector<16x128xf32>
    %cst_5 = arith.constant dense<0.000000e+00> : vector<16xf32>
    %10 = vector.multi_reduction <add>, %9, %cst_5 [1] : vector<16x128xf32> to vector<16xf32>
    %11 = vector.shape_cast %10 : vector<16xf32> to vector<16x1xf32>
    %cst_6 = arith.constant 1.280000e+02 : f32
    %12 = vector.broadcast %cst_6 : f32 to vector<16x1xf32>
    %13 = arith.divf %11, %12 : vector<16x1xf32>
    %c0_7 = arith.constant 0 : index
    %c0_8 = arith.constant 0 : index
    %14 = vector.load %arg3[%c0_7, %c0_8] : memref<16x1xf32, #tpu.memory_space<vmem>>, vector<16x1xf32>
    %cst_9 = arith.constant 9.99999974E-6 : f32
    %15 = vector.broadcast %cst_9 : f32 to vector<16x1xf32>
    %16 = arith.addf %13, %15 : vector<16x1xf32>
    %17 = math.rsqrt %16 : vector<16x1xf32>
    %18 = arith.mulf %14, %17 : vector<16x1xf32>
    %c0_10 = arith.constant 0 : index
    %c0_11 = arith.constant 0 : index
    %19 = vector.load %arg4[%c0_10, %c0_11] : memref<16x1xf32, #tpu.memory_space<vmem>>, vector<16x1xf32>
    %20 = arith.mulf %6, %18 : vector<16x1xf32>
    %21 = arith.subf %19, %20 : vector<16x1xf32>
    %22 = vector.broadcast %18 : vector<16x1xf32> to vector<16x128xf32>
    %23 = arith.mulf %2, %22 : vector<16x128xf32>
    %24 = vector.broadcast %21 : vector<16x1xf32> to vector<16x128xf32>
    %25 = arith.addf %23, %24 : vector<16x128xf32>
    %cst_12 = arith.constant 0.000000e+00 : f32
    %26 = vector.broadcast %cst_12 : f32 to vector<16x128xf32>
    %27 = arith.maximumf %25, %26 : vector<16x128xf32>
    %c0_13 = arith.constant 0 : index
    %c0_14 = arith.constant 0 : index
    %28 = vector.load %arg5[%c0_13, %c0_14] : memref<16x128xf32, #tpu.memory_space<vmem>>, vector<16x128xf32>
    tpu.vector_store %arg5[%c0_13, %c0_14], %27 {strides = array<i32>} : memref<16x128xf32, #tpu.memory_space<vmem>>, vector<16x128xf32>,
    return
  }
  func.func @transform_0(%arg0: i32) -> (i32, i32) {
    %c0_i32 = arith.constant 0 : i32
    %c0_i32_0 = arith.constant 0 : i32
    %c0_i32_1 = arith.constant 0 : i32
    return %c0_i32, %c0_i32_0 : i32, i32
  }
  func.func @transform_1(%arg0: i32) -> (i32, i32) {
    %c0_i32 = arith.constant 0 : i32
    %c0_i32_0 = arith.constant 0 : i32
    %c0_i32_1 = arith.constant 0 : i32
    return %c0_i32, %c0_i32_0 : i32, i32
  }
  func.func @transform_2(%arg0: i32) -> (i32, i32) {
    %c0_i32 = arith.constant 0 : i32
    %c0_i32_0 = arith.constant 0 : i32
    %c0_i32_1 = arith.constant 0 : i32
    return %c0_i32, %c0_i32_0 : i32, i32
  }
  func.func @transform_3(%arg0: i32) -> (i32, i32) {
    %c0_i32 = arith.constant 0 : i32
    %c0_i32_0 = arith.constant 0 : i32
    %c0_i32_1 = arith.constant 0 : i32
    return %c0_i32, %c0_i32_0 : i32, i32
  }
  func.func @transform_4(%arg0: i32) -> (i32, i32) {
    %c0_i32 = arith.constant 0 : i32
    %c0_i32_0 = arith.constant 0 : i32
    %c0_i32_1 = arith.constant 0 : i32
    return %c0_i32, %c0_i32_0 : i32, i32
  }
}

module attributes {stable_mosaic.version = 11 : i64} {
  func.func @_enc2_vq_kernel(%arg0: i32, %arg1: memref<256x32xf32, #tpu.memory_space<vmem>>, %arg2: memref<4x256xf32, #tpu.memory_space<vmem>>, %arg3: memref<4x1xf32, #tpu.memory_space<vmem>>, %arg4: memref<4x1xf32, #tpu.memory_space<vmem>>, %arg5: memref<2x4xf32, #tpu.memory_space<vmem>>, %arg6: memref<2x1xf32, #tpu.memory_space<vmem>>, %arg7: memref<3x2xf32, #tpu.memory_space<vmem>>, %arg8: memref<2x3xf32, #tpu.memory_space<vmem>>, %arg9: memref<3x1xf32, #tpu.memory_space<vmem>>, %arg10: memref<4x2xf32, #tpu.memory_space<vmem>>, %arg11: memref<4x1xf32, #tpu.memory_space<vmem>>, %arg12: memref<4x32xf32, #tpu.memory_space<vmem>>, %arg13: memref<1x1xf32, #tpu.memory_space<vmem>>) attributes {dimension_semantics = [#tpu.dimension_semantics<arbitrary>], iteration_bounds = array<i64: 1>, scalar_prefetch = 0 : i64, scratch_operands = 0 : i64, tpu.core_type = #tpu.core_type<tc>, window_params = [{pipeline_mode = #tpu.pipeline_mode<synchronous>, transform_indices = @transform_0, window_bounds = array<i64: 256, 32>}, {pipeline_mode = #tpu.pipeline_mode<synchronous>, transform_indices = @transform_1, window_bounds = array<i64: 4, 256>}, {pipeline_mode = #tpu.pipeline_mode<synchronous>, transform_indices = @transform_2, window_bounds = array<i64: 4, 1>}, {pipeline_mode = #tpu.pipeline_mode<synchronous>, transform_indices = @transform_3, window_bounds = array<i64: 4, 1>}, {pipeline_mode = #tpu.pipeline_mode<synchronous>, transform_indices = @transform_4, window_bounds = array<i64: 2, 4>}, {pipeline_mode = #tpu.pipeline_mode<synchronous>, transform_indices = @transform_5, window_bounds = array<i64: 2, 1>}, {pipeline_mode = #tpu.pipeline_mode<synchronous>, transform_indices = @transform_6, window_bounds = array<i64: 3, 2>}, {pipeline_mode = #tpu.pipeline_mode<synchronous>, transform_indices = @transform_7, window_bounds = array<i64: 2, 3>}, {pipeline_mode = #tpu.pipeline_mode<synchronous>, transform_indices = @transform_8, window_bounds = array<i64: 3, 1>}, {pipeline_mode = #tpu.pipeline_mode<synchronous>, transform_indices = @transform_9, window_bounds = array<i64: 4, 2>}, {pipeline_mode = #tpu.pipeline_mode<synchronous>, transform_indices = @transform_10, window_bounds = array<i64: 4, 1>}, {pipeline_mode = #tpu.pipeline_mode<synchronous>, transform_indices = @transform_11, window_bounds = array<i64: 4, 32>}, {pipeline_mode = #tpu.pipeline_mode<synchronous>, transform_indices = @transform_12, window_bounds = array<i64: 1, 1>}]} {
    %c0 = arith.constant 0 : index
    %c0_0 = arith.constant 0 : index
    %0 = vector.load %arg2[%c0, %c0_0] : memref<4x256xf32, #tpu.memory_space<vmem>>, vector<4x256xf32>
    %c0_1 = arith.constant 0 : index
    %c0_2 = arith.constant 0 : index
    %1 = vector.load %arg1[%c0_1, %c0_2] : memref<256x32xf32, #tpu.memory_space<vmem>>, vector<256x32xf32>
    %cst = arith.constant dense<0.000000e+00> : vector<4x32xf32>
    %2 = tpu.matmul %0, %1, %cst {dimension_numbers = #tpu.dot_dimension_numbers<[1], [0], [0], [1], [0, 0, 1, 1], [], []>} : vector<4x256xf32>, vector<256x32xf32>, vector<4x32xf32> -> vector<4x32xf32>
    %cst_3 = arith.constant dense<0.000000e+00> : vector<4xf32>
    %3 = vector.multi_reduction <add>, %2, %cst_3 [1] : vector<4x32xf32> to vector<4xf32>
    %4 = vector.shape_cast %3 : vector<4xf32> to vector<4x1xf32>
    %cst_4 = arith.constant 3.200000e+01 : f32
    %5 = vector.broadcast %cst_4 : f32 to vector<4x1xf32>
    %6 = arith.divf %4, %5 : vector<4x1xf32>
    %7 = vector.broadcast %6 : vector<4x1xf32> to vector<4x32xf32>
    %8 = arith.subf %2, %7 : vector<4x32xf32>
    %9 = arith.mulf %8, %8 : vector<4x32xf32>
    %cst_5 = arith.constant dense<0.000000e+00> : vector<4xf32>
    %10 = vector.multi_reduction <add>, %9, %cst_5 [1] : vector<4x32xf32> to vector<4xf32>
    %11 = vector.shape_cast %10 : vector<4xf32> to vector<4x1xf32>
    %cst_6 = arith.constant 3.200000e+01 : f32
    %12 = vector.broadcast %cst_6 : f32 to vector<4x1xf32>
    %13 = arith.divf %11, %12 : vector<4x1xf32>
    %c0_7 = arith.constant 0 : index
    %c0_8 = arith.constant 0 : index
    %14 = vector.load %arg3[%c0_7, %c0_8] : memref<4x1xf32, #tpu.memory_space<vmem>>, vector<4x1xf32>
    %cst_9 = arith.constant 9.99999974E-6 : f32
    %15 = vector.broadcast %cst_9 : f32 to vector<4x1xf32>
    %16 = arith.addf %13, %15 : vector<4x1xf32>
    %17 = math.rsqrt %16 : vector<4x1xf32>
    %18 = arith.mulf %14, %17 : vector<4x1xf32>
    %19 = vector.broadcast %18 : vector<4x1xf32> to vector<4x32xf32>
    %20 = arith.mulf %2, %19 : vector<4x32xf32>
    %c0_10 = arith.constant 0 : index
    %c0_11 = arith.constant 0 : index
    %21 = vector.load %arg4[%c0_10, %c0_11] : memref<4x1xf32, #tpu.memory_space<vmem>>, vector<4x1xf32>
    %22 = arith.mulf %6, %18 : vector<4x1xf32>
    %23 = arith.subf %21, %22 : vector<4x1xf32>
    %24 = vector.broadcast %23 : vector<4x1xf32> to vector<4x32xf32>
    %25 = arith.addf %20, %24 : vector<4x32xf32>
    %cst_12 = arith.constant 0.000000e+00 : f32
    %26 = vector.broadcast %cst_12 : f32 to vector<4x32xf32>
    %27 = arith.maximumf %25, %26 : vector<4x32xf32>
    %c0_13 = arith.constant 0 : index
    %c0_14 = arith.constant 0 : index
    %28 = vector.load %arg5[%c0_13, %c0_14] : memref<2x4xf32, #tpu.memory_space<vmem>>, vector<2x4xf32>
    %cst_15 = arith.constant dense<0.000000e+00> : vector<2x32xf32>
    %29 = tpu.matmul %28, %27, %cst_15 {dimension_numbers = #tpu.dot_dimension_numbers<[1], [0], [0], [1], [0, 0, 1, 1], [], []>} : vector<2x4xf32>, vector<4x32xf32>, vector<2x32xf32> -> vector<2x32xf32>
    %c0_16 = arith.constant 0 : index
    %c0_17 = arith.constant 0 : index
    %30 = vector.load %arg6[%c0_16, %c0_17] : memref<2x1xf32, #tpu.memory_space<vmem>>, vector<2x1xf32>
    %31 = vector.broadcast %30 : vector<2x1xf32> to vector<2x32xf32>
    %32 = arith.addf %29, %31 : vector<2x32xf32>
    %c0_18 = arith.constant 0 : index
    %c0_19 = arith.constant 0 : index
    %33 = vector.load %arg9[%c0_18, %c0_19] : memref<3x1xf32, #tpu.memory_space<vmem>>, vector<3x1xf32>
    %c0_20 = arith.constant 0 : index
    %c0_21 = arith.constant 0 : index
    %34 = vector.load %arg7[%c0_20, %c0_21] : memref<3x2xf32, #tpu.memory_space<vmem>>, vector<3x2xf32>
    %cst_22 = arith.constant dense<0.000000e+00> : vector<3x32xf32>
    %35 = tpu.matmul %34, %32, %cst_22 {dimension_numbers = #tpu.dot_dimension_numbers<[1], [0], [0], [1], [0, 0, 1, 1], [], []>} : vector<3x2xf32>, vector<2x32xf32>, vector<3x32xf32> -> vector<3x32xf32>
    %cst_23 = arith.constant 2.000000e+00 : f32
    %36 = vector.broadcast %cst_23 : f32 to vector<3x32xf32>
    %37 = arith.mulf %36, %35 : vector<3x32xf32>
    %38 = vector.broadcast %33 : vector<3x1xf32> to vector<3x32xf32>
    %39 = arith.subf %38, %37 : vector<3x32xf32>
    %cst_24 = arith.constant dense<0x7F800000> : vector<32xf32>
    %40 = vector.multi_reduction <minimumf>, %39, %cst_24 [0] : vector<3x32xf32> to vector<32xf32>
    %41 = vector.shape_cast %40 : vector<32xf32> to vector<1x32xf32>
    %42 = tpu.iota {dimensions = array<i32: 0>} : vector<3x32xi32>
    %43 = arith.sitofp %42 : vector<3x32xi32> to vector<3x32xf32>
    %44 = vector.broadcast %41 : vector<1x32xf32> to vector<3x32xf32>
    %45 = arith.cmpf oeq, %39, %44 : vector<3x32xf32>
    %cst_25 = arith.constant 3.000000e+00 : f32
    %46 = vector.broadcast %cst_25 : f32 to vector<3x32xf32>
    %47 = arith.select %45, %43, %46 : vector<3x32xi1>, vector<3x32xf32>
    %cst_26 = arith.constant dense<0x7F800000> : vector<32xf32>
    %48 = vector.multi_reduction <minimumf>, %47, %cst_26 [0] : vector<3x32xf32> to vector<32xf32>
    %49 = vector.shape_cast %48 : vector<32xf32> to vector<1x32xf32>
    %50 = vector.broadcast %49 : vector<1x32xf32> to vector<3x32xf32>
    %51 = arith.cmpf oeq, %43, %50 : vector<3x32xf32>
    %52 = arith.extui %51 : vector<3x32xi1> to vector<3x32xi32>
    %53 = arith.sitofp %52 : vector<3x32xi32> to vector<3x32xf32>
    %c0_27 = arith.constant 0 : index
    %c0_28 = arith.constant 0 : index
    %54 = vector.load %arg8[%c0_27, %c0_28] : memref<2x3xf32, #tpu.memory_space<vmem>>, vector<2x3xf32>
    %cst_29 = arith.constant dense<0.000000e+00> : vector<2x32xf32>
    %55 = tpu.matmul %54, %53, %cst_29 {dimension_numbers = #tpu.dot_dimension_numbers<[1], [0], [0], [1], [0, 0, 1, 1], [], []>} : vector<2x3xf32>, vector<3x32xf32>, vector<2x32xf32> -> vector<2x32xf32>
    %56 = arith.subf %55, %32 : vector<2x32xf32>
    %57 = arith.mulf %56, %56 : vector<2x32xf32>
    %cst_30 = arith.constant dense<0.000000e+00> : vector<2xf32>
    %58 = vector.multi_reduction <add>, %57, %cst_30 [1] : vector<2x32xf32> to vector<2xf32>
    %59 = vector.shape_cast %58 : vector<2xf32> to vector<2x1xf32>
    %cst_31 = arith.constant dense<0.000000e+00> : vector<1xf32>
    %60 = vector.multi_reduction <add>, %59, %cst_31 [0] : vector<2x1xf32> to vector<1xf32>
    %61 = vector.shape_cast %60 : vector<1xf32> to vector<1x1xf32>
    %cst_32 = arith.constant 1.200000e+00 : f32
    %62 = vector.broadcast %cst_32 : f32 to vector<1x1xf32>
    %63 = arith.mulf %62, %61 : vector<1x1xf32>
    %cst_33 = arith.constant 6.400000e+01 : f32
    %64 = vector.broadcast %cst_33 : f32 to vector<1x1xf32>
    %65 = arith.divf %63, %64 : vector<1x1xf32>
    %c0_34 = arith.constant 0 : index
    %c0_35 = arith.constant 0 : index
    %66 = vector.load %arg13[%c0_34, %c0_35] : memref<1x1xf32, #tpu.memory_space<vmem>>, vector<1x1xf32>
    tpu.vector_store %arg13[%c0_34, %c0_35], %65 {strides = array<i32>} : memref<1x1xf32, #tpu.memory_space<vmem>>, vector<1x1xf32>,
    %c0_36 = arith.constant 0 : index
    %c0_37 = arith.constant 0 : index
    %67 = vector.load %arg10[%c0_36, %c0_37] : memref<4x2xf32, #tpu.memory_space<vmem>>, vector<4x2xf32>
    %cst_38 = arith.constant dense<0.000000e+00> : vector<4x32xf32>
    %68 = tpu.matmul %67, %55, %cst_38 {dimension_numbers = #tpu.dot_dimension_numbers<[1], [0], [0], [1], [0, 0, 1, 1], [], []>} : vector<4x2xf32>, vector<2x32xf32>, vector<4x32xf32> -> vector<4x32xf32>
    %c0_39 = arith.constant 0 : index
    %c0_40 = arith.constant 0 : index
    %69 = vector.load %arg11[%c0_39, %c0_40] : memref<4x1xf32, #tpu.memory_space<vmem>>, vector<4x1xf32>
    %70 = vector.broadcast %69 : vector<4x1xf32> to vector<4x32xf32>
    %71 = arith.addf %68, %70 : vector<4x32xf32>
    %c0_41 = arith.constant 0 : index
    %c0_42 = arith.constant 0 : index
    %72 = vector.load %arg12[%c0_41, %c0_42] : memref<4x32xf32, #tpu.memory_space<vmem>>, vector<4x32xf32>
    tpu.vector_store %arg12[%c0_41, %c0_42], %71 {strides = array<i32>} : memref<4x32xf32, #tpu.memory_space<vmem>>, vector<4x32xf32>,
    return
  }
  func.func @transform_0(%arg0: i32) -> (i32, i32) {
    %c0_i32 = arith.constant 0 : i32
    %c0_i32_0 = arith.constant 0 : i32
    %c0_i32_1 = arith.constant 0 : i32
    return %c0_i32, %c0_i32_0 : i32, i32
  }
  func.func @transform_1(%arg0: i32) -> (i32, i32) {
    %c0_i32 = arith.constant 0 : i32
    %c0_i32_0 = arith.constant 0 : i32
    %c0_i32_1 = arith.constant 0 : i32
    return %c0_i32, %c0_i32_0 : i32, i32
  }
  func.func @transform_2(%arg0: i32) -> (i32, i32) {
    %c0_i32 = arith.constant 0 : i32
    %c0_i32_0 = arith.constant 0 : i32
    %c0_i32_1 = arith.constant 0 : i32
    return %c0_i32, %c0_i32_0 : i32, i32
  }
  func.func @transform_3(%arg0: i32) -> (i32, i32) {
    %c0_i32 = arith.constant 0 : i32
    %c0_i32_0 = arith.constant 0 : i32
    %c0_i32_1 = arith.constant 0 : i32
    return %c0_i32, %c0_i32_0 : i32, i32
  }
  func.func @transform_4(%arg0: i32) -> (i32, i32) {
    %c0_i32 = arith.constant 0 : i32
    %c0_i32_0 = arith.constant 0 : i32
    %c0_i32_1 = arith.constant 0 : i32
    return %c0_i32, %c0_i32_0 : i32, i32
  }
  func.func @transform_5(%arg0: i32) -> (i32, i32) {
    %c0_i32 = arith.constant 0 : i32
    %c0_i32_0 = arith.constant 0 : i32
    %c0_i32_1 = arith.constant 0 : i32
    return %c0_i32, %c0_i32_0 : i32, i32
  }
  func.func @transform_6(%arg0: i32) -> (i32, i32) {
    %c0_i32 = arith.constant 0 : i32
    %c0_i32_0 = arith.constant 0 : i32
    %c0_i32_1 = arith.constant 0 : i32
    return %c0_i32, %c0_i32_0 : i32, i32
  }
  func.func @transform_7(%arg0: i32) -> (i32, i32) {
    %c0_i32 = arith.constant 0 : i32
    %c0_i32_0 = arith.constant 0 : i32
    %c0_i32_1 = arith.constant 0 : i32
    return %c0_i32, %c0_i32_0 : i32, i32
  }
  func.func @transform_8(%arg0: i32) -> (i32, i32) {
    %c0_i32 = arith.constant 0 : i32
    %c0_i32_0 = arith.constant 0 : i32
    %c0_i32_1 = arith.constant 0 : i32
    return %c0_i32, %c0_i32_0 : i32, i32
  }
  func.func @transform_9(%arg0: i32) -> (i32, i32) {
    %c0_i32 = arith.constant 0 : i32
    %c0_i32_0 = arith.constant 0 : i32
    %c0_i32_1 = arith.constant 0 : i32
    return %c0_i32, %c0_i32_0 : i32, i32
  }
  func.func @transform_10(%arg0: i32) -> (i32, i32) {
    %c0_i32 = arith.constant 0 : i32
    %c0_i32_0 = arith.constant 0 : i32
    %c0_i32_1 = arith.constant 0 : i32
    return %c0_i32, %c0_i32_0 : i32, i32
  }
  func.func @transform_11(%arg0: i32) -> (i32, i32) {
    %c0_i32 = arith.constant 0 : i32
    %c0_i32_0 = arith.constant 0 : i32
    %c0_i32_1 = arith.constant 0 : i32
    return %c0_i32, %c0_i32_0 : i32, i32
  }
  func.func @transform_12(%arg0: i32) -> (i32, i32) {
    %c0_i32 = arith.constant 0 : i32
    %c0_i32_0 = arith.constant 0 : i32
    %c0_i32_1 = arith.constant 0 : i32
    return %c0_i32, %c0_i32_0 : i32, i32
  }
}

module attributes {stable_mosaic.version = 11 : i64} {
  func.func @_convt_bn_relu_kernel(%arg0: i32, %arg1: memref<4x16x32xf32, #tpu.memory_space<vmem>>, %arg2: memref<4x16x16xf32, #tpu.memory_space<vmem>>, %arg3: memref<16x1xf32, #tpu.memory_space<vmem>>, %arg4: memref<16x1xf32, #tpu.memory_space<vmem>>, %arg5: memref<16x128xf32, #tpu.memory_space<vmem>>) attributes {dimension_semantics = [#tpu.dimension_semantics<arbitrary>], iteration_bounds = array<i64: 1>, scalar_prefetch = 0 : i64, scratch_operands = 0 : i64, tpu.core_type = #tpu.core_type<tc>, window_params = [{pipeline_mode = #tpu.pipeline_mode<synchronous>, transform_indices = @transform_0, window_bounds = array<i64: 4, 16, 32>}, {pipeline_mode = #tpu.pipeline_mode<synchronous>, transform_indices = @transform_1, window_bounds = array<i64: 4, 16, 16>}, {pipeline_mode = #tpu.pipeline_mode<synchronous>, transform_indices = @transform_2, window_bounds = array<i64: 16, 1>}, {pipeline_mode = #tpu.pipeline_mode<synchronous>, transform_indices = @transform_3, window_bounds = array<i64: 16, 1>}, {pipeline_mode = #tpu.pipeline_mode<synchronous>, transform_indices = @transform_4, window_bounds = array<i64: 16, 128>}]} {
    %c0 = arith.constant 0 : index
    %c0_0 = arith.constant 0 : index
    %c0_1 = arith.constant 0 : index
    %0 = vector.load %arg2[%c0, %c0_0, %c0_1] : memref<4x16x16xf32, #tpu.memory_space<vmem>>, vector<1x16x16xf32>
    %1 = vector.shape_cast %0 : vector<1x16x16xf32> to vector<16x16xf32>
    %c0_2 = arith.constant 0 : index
    %c0_3 = arith.constant 0 : index
    %c0_4 = arith.constant 0 : index
    %2 = vector.load %arg1[%c0_2, %c0_3, %c0_4] : memref<4x16x32xf32, #tpu.memory_space<vmem>>, vector<1x16x32xf32>
    %3 = vector.shape_cast %2 : vector<1x16x32xf32> to vector<16x32xf32>
    %cst = arith.constant dense<0.000000e+00> : vector<16x32xf32>
    %4 = tpu.matmul %1, %3, %cst {dimension_numbers = #tpu.dot_dimension_numbers<[1], [0], [0], [1], [0, 0, 1, 1], [], []>} : vector<16x16xf32>, vector<16x32xf32>, vector<16x32xf32> -> vector<16x32xf32>
    %c1 = arith.constant 1 : index
    %c0_5 = arith.constant 0 : index
    %c0_6 = arith.constant 0 : index
    %5 = vector.load %arg2[%c1, %c0_5, %c0_6] : memref<4x16x16xf32, #tpu.memory_space<vmem>>, vector<1x16x16xf32>
    %6 = vector.shape_cast %5 : vector<1x16x16xf32> to vector<16x16xf32>
    %c1_7 = arith.constant 1 : index
    %c0_8 = arith.constant 0 : index
    %c0_9 = arith.constant 0 : index
    %7 = vector.load %arg1[%c1_7, %c0_8, %c0_9] : memref<4x16x32xf32, #tpu.memory_space<vmem>>, vector<1x16x32xf32>
    %8 = vector.shape_cast %7 : vector<1x16x32xf32> to vector<16x32xf32>
    %cst_10 = arith.constant dense<0.000000e+00> : vector<16x32xf32>
    %9 = tpu.matmul %6, %8, %cst_10 {dimension_numbers = #tpu.dot_dimension_numbers<[1], [0], [0], [1], [0, 0, 1, 1], [], []>} : vector<16x16xf32>, vector<16x32xf32>, vector<16x32xf32> -> vector<16x32xf32>
    %c2 = arith.constant 2 : index
    %c0_11 = arith.constant 0 : index
    %c0_12 = arith.constant 0 : index
    %10 = vector.load %arg2[%c2, %c0_11, %c0_12] : memref<4x16x16xf32, #tpu.memory_space<vmem>>, vector<1x16x16xf32>
    %11 = vector.shape_cast %10 : vector<1x16x16xf32> to vector<16x16xf32>
    %c2_13 = arith.constant 2 : index
    %c0_14 = arith.constant 0 : index
    %c0_15 = arith.constant 0 : index
    %12 = vector.load %arg1[%c2_13, %c0_14, %c0_15] : memref<4x16x32xf32, #tpu.memory_space<vmem>>, vector<1x16x32xf32>
    %13 = vector.shape_cast %12 : vector<1x16x32xf32> to vector<16x32xf32>
    %cst_16 = arith.constant dense<0.000000e+00> : vector<16x32xf32>
    %14 = tpu.matmul %11, %13, %cst_16 {dimension_numbers = #tpu.dot_dimension_numbers<[1], [0], [0], [1], [0, 0, 1, 1], [], []>} : vector<16x16xf32>, vector<16x32xf32>, vector<16x32xf32> -> vector<16x32xf32>
    %c3 = arith.constant 3 : index
    %c0_17 = arith.constant 0 : index
    %c0_18 = arith.constant 0 : index
    %15 = vector.load %arg2[%c3, %c0_17, %c0_18] : memref<4x16x16xf32, #tpu.memory_space<vmem>>, vector<1x16x16xf32>
    %16 = vector.shape_cast %15 : vector<1x16x16xf32> to vector<16x16xf32>
    %c3_19 = arith.constant 3 : index
    %c0_20 = arith.constant 0 : index
    %c0_21 = arith.constant 0 : index
    %17 = vector.load %arg1[%c3_19, %c0_20, %c0_21] : memref<4x16x32xf32, #tpu.memory_space<vmem>>, vector<1x16x32xf32>
    %18 = vector.shape_cast %17 : vector<1x16x32xf32> to vector<16x32xf32>
    %cst_22 = arith.constant dense<0.000000e+00> : vector<16x32xf32>
    %19 = tpu.matmul %16, %18, %cst_22 {dimension_numbers = #tpu.dot_dimension_numbers<[1], [0], [0], [1], [0, 0, 1, 1], [], []>} : vector<16x16xf32>, vector<16x32xf32>, vector<16x32xf32> -> vector<16x32xf32>
    %20 = tpu.concatenate %4, %9, %14, %19 in 1 : vector<16x32xf32>, vector<16x32xf32>, vector<16x32xf32>, vector<16x32xf32> -> vector<16x128xf32>
    %cst_23 = arith.constant dense<0.000000e+00> : vector<16xf32>
    %21 = vector.multi_reduction <add>, %20, %cst_23 [1] : vector<16x128xf32> to vector<16xf32>
    %22 = vector.shape_cast %21 : vector<16xf32> to vector<16x1xf32>
    %cst_24 = arith.constant 1.280000e+02 : f32
    %23 = vector.broadcast %cst_24 : f32 to vector<16x1xf32>
    %24 = arith.divf %22, %23 : vector<16x1xf32>
    %25 = vector.broadcast %24 : vector<16x1xf32> to vector<16x128xf32>
    %26 = arith.subf %20, %25 : vector<16x128xf32>
    %27 = arith.mulf %26, %26 : vector<16x128xf32>
    %cst_25 = arith.constant dense<0.000000e+00> : vector<16xf32>
    %28 = vector.multi_reduction <add>, %27, %cst_25 [1] : vector<16x128xf32> to vector<16xf32>
    %29 = vector.shape_cast %28 : vector<16xf32> to vector<16x1xf32>
    %cst_26 = arith.constant 1.280000e+02 : f32
    %30 = vector.broadcast %cst_26 : f32 to vector<16x1xf32>
    %31 = arith.divf %29, %30 : vector<16x1xf32>
    %c0_27 = arith.constant 0 : index
    %c0_28 = arith.constant 0 : index
    %32 = vector.load %arg3[%c0_27, %c0_28] : memref<16x1xf32, #tpu.memory_space<vmem>>, vector<16x1xf32>
    %cst_29 = arith.constant 9.99999974E-6 : f32
    %33 = vector.broadcast %cst_29 : f32 to vector<16x1xf32>
    %34 = arith.addf %31, %33 : vector<16x1xf32>
    %35 = math.rsqrt %34 : vector<16x1xf32>
    %36 = arith.mulf %32, %35 : vector<16x1xf32>
    %37 = vector.broadcast %36 : vector<16x1xf32> to vector<16x128xf32>
    %38 = arith.mulf %20, %37 : vector<16x128xf32>
    %c0_30 = arith.constant 0 : index
    %c0_31 = arith.constant 0 : index
    %39 = vector.load %arg4[%c0_30, %c0_31] : memref<16x1xf32, #tpu.memory_space<vmem>>, vector<16x1xf32>
    %40 = arith.mulf %24, %36 : vector<16x1xf32>
    %41 = arith.subf %39, %40 : vector<16x1xf32>
    %42 = vector.broadcast %41 : vector<16x1xf32> to vector<16x128xf32>
    %43 = arith.addf %38, %42 : vector<16x128xf32>
    %cst_32 = arith.constant 0.000000e+00 : f32
    %44 = vector.broadcast %cst_32 : f32 to vector<16x128xf32>
    %45 = arith.maximumf %43, %44 : vector<16x128xf32>
    %c0_33 = arith.constant 0 : index
    %c0_34 = arith.constant 0 : index
    %46 = vector.load %arg5[%c0_33, %c0_34] : memref<16x128xf32, #tpu.memory_space<vmem>>, vector<16x128xf32>
    tpu.vector_store %arg5[%c0_33, %c0_34], %45 {strides = array<i32>} : memref<16x128xf32, #tpu.memory_space<vmem>>, vector<16x128xf32>,
    return
  }
  func.func @transform_0(%arg0: i32) -> (i32, i32, i32) {
    %c0_i32 = arith.constant 0 : i32
    %c0_i32_0 = arith.constant 0 : i32
    %c0_i32_1 = arith.constant 0 : i32
    %c0_i32_2 = arith.constant 0 : i32
    return %c0_i32, %c0_i32_0, %c0_i32_1 : i32, i32, i32
  }
  func.func @transform_1(%arg0: i32) -> (i32, i32, i32) {
    %c0_i32 = arith.constant 0 : i32
    %c0_i32_0 = arith.constant 0 : i32
    %c0_i32_1 = arith.constant 0 : i32
    %c0_i32_2 = arith.constant 0 : i32
    return %c0_i32, %c0_i32_0, %c0_i32_1 : i32, i32, i32
  }
  func.func @transform_2(%arg0: i32) -> (i32, i32) {
    %c0_i32 = arith.constant 0 : i32
    %c0_i32_0 = arith.constant 0 : i32
    %c0_i32_1 = arith.constant 0 : i32
    return %c0_i32, %c0_i32_0 : i32, i32
  }
  func.func @transform_3(%arg0: i32) -> (i32, i32) {
    %c0_i32 = arith.constant 0 : i32
    %c0_i32_0 = arith.constant 0 : i32
    %c0_i32_1 = arith.constant 0 : i32
    return %c0_i32, %c0_i32_0 : i32, i32
  }
  func.func @transform_4(%arg0: i32) -> (i32, i32) {
    %c0_i32 = arith.constant 0 : i32
    %c0_i32_0 = arith.constant 0 : i32
    %c0_i32_1 = arith.constant 0 : i32
    return %c0_i32, %c0_i32_0 : i32, i32
  }
}

module attributes {stable_mosaic.version = 11 : i64} {
  func.func @_convt_bias_tanh_kernel(%arg0: i32, %arg1: memref<4x64x128xf32, #tpu.memory_space<vmem>>, %arg2: memref<4x4x64xf32, #tpu.memory_space<vmem>>, %arg3: memref<4x1xf32, #tpu.memory_space<vmem>>, %arg4: memref<4x512xf32, #tpu.memory_space<vmem>>) attributes {dimension_semantics = [#tpu.dimension_semantics<arbitrary>], iteration_bounds = array<i64: 1>, scalar_prefetch = 0 : i64, scratch_operands = 0 : i64, tpu.core_type = #tpu.core_type<tc>, window_params = [{pipeline_mode = #tpu.pipeline_mode<synchronous>, transform_indices = @transform_0, window_bounds = array<i64: 4, 64, 128>}, {pipeline_mode = #tpu.pipeline_mode<synchronous>, transform_indices = @transform_1, window_bounds = array<i64: 4, 4, 64>}, {pipeline_mode = #tpu.pipeline_mode<synchronous>, transform_indices = @transform_2, window_bounds = array<i64: 4, 1>}, {pipeline_mode = #tpu.pipeline_mode<synchronous>, transform_indices = @transform_3, window_bounds = array<i64: 4, 512>}]} {
    %c0 = arith.constant 0 : index
    %c0_0 = arith.constant 0 : index
    %c0_1 = arith.constant 0 : index
    %0 = vector.load %arg2[%c0, %c0_0, %c0_1] : memref<4x4x64xf32, #tpu.memory_space<vmem>>, vector<1x4x64xf32>
    %1 = vector.shape_cast %0 : vector<1x4x64xf32> to vector<4x64xf32>
    %c0_2 = arith.constant 0 : index
    %c0_3 = arith.constant 0 : index
    %c0_4 = arith.constant 0 : index
    %2 = vector.load %arg1[%c0_2, %c0_3, %c0_4] : memref<4x64x128xf32, #tpu.memory_space<vmem>>, vector<1x64x128xf32>
    %3 = vector.shape_cast %2 : vector<1x64x128xf32> to vector<64x128xf32>
    %cst = arith.constant dense<0.000000e+00> : vector<4x128xf32>
    %4 = tpu.matmul %1, %3, %cst {dimension_numbers = #tpu.dot_dimension_numbers<[1], [0], [0], [1], [0, 0, 1, 1], [], []>} : vector<4x64xf32>, vector<64x128xf32>, vector<4x128xf32> -> vector<4x128xf32>
    %c1 = arith.constant 1 : index
    %c0_5 = arith.constant 0 : index
    %c0_6 = arith.constant 0 : index
    %5 = vector.load %arg2[%c1, %c0_5, %c0_6] : memref<4x4x64xf32, #tpu.memory_space<vmem>>, vector<1x4x64xf32>
    %6 = vector.shape_cast %5 : vector<1x4x64xf32> to vector<4x64xf32>
    %c1_7 = arith.constant 1 : index
    %c0_8 = arith.constant 0 : index
    %c0_9 = arith.constant 0 : index
    %7 = vector.load %arg1[%c1_7, %c0_8, %c0_9] : memref<4x64x128xf32, #tpu.memory_space<vmem>>, vector<1x64x128xf32>
    %8 = vector.shape_cast %7 : vector<1x64x128xf32> to vector<64x128xf32>
    %cst_10 = arith.constant dense<0.000000e+00> : vector<4x128xf32>
    %9 = tpu.matmul %6, %8, %cst_10 {dimension_numbers = #tpu.dot_dimension_numbers<[1], [0], [0], [1], [0, 0, 1, 1], [], []>} : vector<4x64xf32>, vector<64x128xf32>, vector<4x128xf32> -> vector<4x128xf32>
    %c2 = arith.constant 2 : index
    %c0_11 = arith.constant 0 : index
    %c0_12 = arith.constant 0 : index
    %10 = vector.load %arg2[%c2, %c0_11, %c0_12] : memref<4x4x64xf32, #tpu.memory_space<vmem>>, vector<1x4x64xf32>
    %11 = vector.shape_cast %10 : vector<1x4x64xf32> to vector<4x64xf32>
    %c2_13 = arith.constant 2 : index
    %c0_14 = arith.constant 0 : index
    %c0_15 = arith.constant 0 : index
    %12 = vector.load %arg1[%c2_13, %c0_14, %c0_15] : memref<4x64x128xf32, #tpu.memory_space<vmem>>, vector<1x64x128xf32>
    %13 = vector.shape_cast %12 : vector<1x64x128xf32> to vector<64x128xf32>
    %cst_16 = arith.constant dense<0.000000e+00> : vector<4x128xf32>
    %14 = tpu.matmul %11, %13, %cst_16 {dimension_numbers = #tpu.dot_dimension_numbers<[1], [0], [0], [1], [0, 0, 1, 1], [], []>} : vector<4x64xf32>, vector<64x128xf32>, vector<4x128xf32> -> vector<4x128xf32>
    %c3 = arith.constant 3 : index
    %c0_17 = arith.constant 0 : index
    %c0_18 = arith.constant 0 : index
    %15 = vector.load %arg2[%c3, %c0_17, %c0_18] : memref<4x4x64xf32, #tpu.memory_space<vmem>>, vector<1x4x64xf32>
    %16 = vector.shape_cast %15 : vector<1x4x64xf32> to vector<4x64xf32>
    %c3_19 = arith.constant 3 : index
    %c0_20 = arith.constant 0 : index
    %c0_21 = arith.constant 0 : index
    %17 = vector.load %arg1[%c3_19, %c0_20, %c0_21] : memref<4x64x128xf32, #tpu.memory_space<vmem>>, vector<1x64x128xf32>
    %18 = vector.shape_cast %17 : vector<1x64x128xf32> to vector<64x128xf32>
    %cst_22 = arith.constant dense<0.000000e+00> : vector<4x128xf32>
    %19 = tpu.matmul %16, %18, %cst_22 {dimension_numbers = #tpu.dot_dimension_numbers<[1], [0], [0], [1], [0, 0, 1, 1], [], []>} : vector<4x64xf32>, vector<64x128xf32>, vector<4x128xf32> -> vector<4x128xf32>
    %20 = tpu.concatenate %4, %9, %14, %19 in 1 : vector<4x128xf32>, vector<4x128xf32>, vector<4x128xf32>, vector<4x128xf32> -> vector<4x512xf32>
    %c0_23 = arith.constant 0 : index
    %c0_24 = arith.constant 0 : index
    %21 = vector.load %arg3[%c0_23, %c0_24] : memref<4x1xf32, #tpu.memory_space<vmem>>, vector<4x1xf32>
    %22 = vector.broadcast %21 : vector<4x1xf32> to vector<4x512xf32>
    %23 = arith.addf %20, %22 : vector<4x512xf32>
    %24 = math.tanh %23 : vector<4x512xf32>
    %c0_25 = arith.constant 0 : index
    %c0_26 = arith.constant 0 : index
    %25 = vector.load %arg4[%c0_25, %c0_26] : memref<4x512xf32, #tpu.memory_space<vmem>>, vector<4x512xf32>
    tpu.vector_store %arg4[%c0_25, %c0_26], %24 {strides = array<i32>} : memref<4x512xf32, #tpu.memory_space<vmem>>, vector<4x512xf32>,
    return
  }
  func.func @transform_0(%arg0: i32) -> (i32, i32, i32) {
    %c0_i32 = arith.constant 0 : i32
    %c0_i32_0 = arith.constant 0 : i32
    %c0_i32_1 = arith.constant 0 : i32
    %c0_i32_2 = arith.constant 0 : i32
    return %c0_i32, %c0_i32_0, %c0_i32_1 : i32, i32, i32
  }
  func.func @transform_1(%arg0: i32) -> (i32, i32, i32) {
    %c0_i32 = arith.constant 0 : i32
    %c0_i32_0 = arith.constant 0 : i32
    %c0_i32_1 = arith.constant 0 : i32
    %c0_i32_2 = arith.constant 0 : i32
    return %c0_i32, %c0_i32_0, %c0_i32_1 : i32, i32, i32
  }
  func.func @transform_2(%arg0: i32) -> (i32, i32) {
    %c0_i32 = arith.constant 0 : i32
    %c0_i32_0 = arith.constant 0 : i32
    %c0_i32_1 = arith.constant 0 : i32
    return %c0_i32, %c0_i32_0 : i32, i32
  }
  func.func @transform_3(%arg0: i32) -> (i32, i32) {
    %c0_i32 = arith.constant 0 : i32
    %c0_i32_0 = arith.constant 0 : i32
    %c0_i32_1 = arith.constant 0 : i32
    return %c0_i32, %c0_i32_0 : i32, i32
  }
}

</mosaic_0001>

<bundles_post_ra>
// kernel: vqvae_forward.4
= control target key start
LH: loop header
LB: loop body
LE: loop exit
PB: predicated region body
PF: predicated region fallthrough
CT: control target
= control target key end

     0   :  { %vm27_vm0 = vcmask 523264   ;;  %v165_v12 = vmov 128.0   ;;  %v166_v27 = vmov 0   ;;  %s250_s0 = inlined_call_operand.vmem [shape: f32[64,128], index: 0, kind: input, shape index: {}]   ;;  %s251_s1 = inlined_call_operand.vmem [shape: f32[16,64], index: 1, kind: input, shape index: {}]   ;;  %s252_s2 = inlined_call_operand.vmem [shape: f32[16,1], index: 2, kind: input, shape index: {}]   ;;  %s253_s3 = inlined_call_operand.vmem [shape: f32[16,1], index: 3, kind: input, shape index: {}]   ;;  %s254_s4 = inlined_call_operand.vmem [shape: f32[16,128], index: 4, kind: output, shape index: {}]  }
   0x1   :  { %v26_v0 = vld [vmem:[%s250_s0 + $0x38] sm:$0xff]  ;;  %v25_v1 = vld [vmem:[%s250_s0 + $0x30] sm:$0xff]  ;;  %v24_v2 = vld [vmem:[%s250_s0 + $0x28] sm:$0xff]  ;;  %159 = vrcp.f32 %v165_v12  ;;  %156 = vset.pattern.permute.xlu2 %v166_v27  ;;  %157 = vset.pattern.permute.xlu0 %v166_v27 }
   0x2   :  { %42 = vmatpush.msra.mxu0 %v26_v0  ;;  %146 = vmatpush.msra.mxu1 %v26_v0  ;;  %v23_v3 = vld [vmem:[%s250_s0 + $0x20] sm:$0xff]  ;;  %v22_v4 = vld [vmem:[%s250_s0 + $0x18] sm:$0xff]  ;;  %v21_v5 = vld [vmem:[%s250_s0 + $0x10] sm:$0xff] }
   0x3   :  { %v20_v6 = vld [vmem:[%s250_s0 + $0x8] sm:$0xff]  ;;  %v19_v7 = vld [vmem:[%s250_s0] sm:$0xff]  ;;  %158 = vset.pattern.permute.xlu1 %v166_v27 }
   0x4   :  { %43 = vmatpush.msra.mxu0 %v25_v1  ;;  %147 = vmatpush.msra.mxu1 %v25_v1  ;;  %v17_v8 = vld [vmem:[%s251_s1] sm:$0xff]  ;;  %v18_v9 = vld [vmem:[%s251_s1 + $0x8] sm:$0xff] }
   0x5   :  { %v80_v41 = vld [vmem:[%s252_s2] sm:$0xff]  ;;  %v81_v51 = vld [vmem:[%s252_s2 + $0x8] sm:$0xff] }
   0x6   :  { %44 = vmatpush.msra.mxu0 %v24_v2  ;;  %148 = vmatpush.msra.mxu1 %v24_v2  ;;  %v106_v47 = vld [vmem:[%s253_s3] sm:$0xff]  ;;  %v107_v55 = vld [vmem:[%s253_s3 + $0x8] sm:$0xff] }
   0x7   :  { %v160_v13 = vpop.eup %159 }
   0x8   :  { %45 = vmatpush.msra.mxu0 %v23_v3  ;;  %149 = vmatpush.msra.mxu1 %v23_v3  ;;  %v62_v14 = vmul.f32 128.0, %v160_v13  ;;  %vm66_vm1 = vweird.f32 %v160_v13 }
   0xa   :  { %46 = vmatpush.msra.mxu0 %v22_v4  ;;  %150 = vmatpush.msra.mxu1 %v22_v4  ;;  %v63_v15 = vsub.f32 1.0, %v62_v14 }
   0xc   :  { %47 = vmatpush.msra.mxu0 %v21_v5  ;;  %151 = vmatpush.msra.mxu1 %v21_v5  ;;  %v64_v16 = vmul.f32 %v160_v13, %v63_v15 }
   0xe   :  { %48 = vmatpush.msra.mxu0 %v20_v6  ;;  %152 = vmatpush.msra.mxu1 %v20_v6  ;;  %v65_v17 = vadd.f32 %v160_v13, %v64_v16 }
  0x10   :  { %49 = vmatpush.msra.mxu0 %v19_v7  ;;  %153 = vmatpush.msra.mxu1 %v19_v7  ;;  %v67_v18 = vsel %vm66_vm1, %v160_v13, %v65_v17 }
  0x11   :  { %144 = vmatmul.msk.f32.vlgmr.msra.gmra.mxu0 %vm27_vm0, %v17_v8  ;;  %145 = vmatmul.msk.f32.vlgmr.msra.gmra.mxu1 %vm27_vm0, %v18_v9 }
  0x8e   :  { %v222_v10 = vpop.f32.mrf.mxu0  ;;  %v225_v11 = vpop.f32.mrf.mxu1 }
  0x8f   :  { %57 = vadd.xlane.f32.xlu0 %v222_v10 }
  0x97   :  { %59 = vadd.xlane.f32.xlu0 %v225_v11 }
 0x102   :  { %v58_v19 = vpop.xlane.xlu0 %57 }
 0x103   :  { %v68_v20 = vmul.f32 %v67_v18, %v58_v19 }
 0x105   :  { %v70_v21 = vsub.f32 %v222_v10, %v68_v20 }
 0x107   :  { %v72_v22 = vmul.f32 %v70_v21, %v70_v21 }
 0x109   :  { %74 = vadd.xlane.f32.xlu1 %v72_v22 }
 0x10a   :  { %v60_v23 = vpop.xlane.xlu0 %59 }
 0x10b   :  { %v69_v24 = vmul.f32 %v67_v18, %v60_v23 }
 0x10d   :  { %v71_v25 = vsub.f32 %v225_v11, %v69_v24 }
 0x10f   :  { %v73_v26 = vmul.f32 %v71_v25, %v71_v25 }
 0x111   :  { %76 = vadd.xlane.f32.xlu1 %v73_v26 }
 0x17c   :  { %v75_v28 = vpop.xlane.xlu1 %74 }
 0x17d   :  { %v78_v29 = vmul.f32 %v75_v28, %v67_v18 }
 0x17f   :  { %v82_v30 = vadd.f32 1e-05, %v78_v29 }
 0x181   :  { %161 = vrsqrt.f32 %v82_v30  ;;  %vm90_vm3 = vweird.f32 %v82_v30 }
 0x184   :  { %v77_v31 = vpop.xlane.xlu1 %76 }
 0x185   :  { %v79_v32 = vmul.f32 %v77_v31, %v67_v18 }
 0x187   :  { %v162_v33 = vpop.eup %161  ;;  %v83_v34 = vadd.f32 1e-05, %v79_v32 }
 0x188   :  { %v85_v35 = vmul.f32 %v162_v33, %v82_v30  ;;  %vm91_vm2 = vweird.f32 %v162_v33 }
 0x189   :  { %163 = vrsqrt.f32 %v83_v34  ;;  %vm92_vm4 = vmor %vm90_vm3, %vm91_vm2  ;;  %vm100_vm6 = vweird.f32 %v83_v34 }
 0x18a   :  { %v86_v36 = vmul.f32 %v162_v33, %v85_v35 }
 0x18c   :  { %v87_v37 = vmul.f32 0.5, %v86_v36 }
 0x18e   :  { %v88_v38 = vsub.f32 1.5, %v87_v37 }
 0x18f   :  { %v164_v39 = vpop.eup %163 }
 0x190   :  { %v95_v40 = vmul.f32 %v164_v39, %v83_v34  ;;  %v89_v42 = vmul.f32 %v162_v33, %v88_v38  ;;  %vm101_vm5 = vweird.f32 %v164_v39 }
 0x191   :  { %vm102_vm7 = vmor %vm100_vm6, %vm101_vm5 }
 0x192   :  { %v96_v43 = vmul.f32 %v164_v39, %v95_v40  ;;  %v93_v44 = vsel %vm92_vm4, %v162_v33, %v89_v42 }
 0x193   :  { %v104_v45 = vmul.f32 %v93_v44, %v80_v41 }
 0x194   :  { %v97_v46 = vmul.f32 0.5, %v96_v43 }
 0x195   :  { %114 = vperm.xlu2 %156, %v104_v45   ;;  %v108_v48 = vmul.f32 %v104_v45, %v68_v20 }
 0x196   :  { %v98_v49 = vsub.f32 1.5, %v97_v46 }
 0x197   :  { %v110_v50 = vsub.f32 %v106_v47, %v108_v48 }
 0x198   :  { %v99_v52 = vmul.f32 %v164_v39, %v98_v49 }
 0x199   :  { %126 = vperm.xlu0 %157, %v110_v50  }
 0x19a   :  { %v103_v53 = vsel %vm102_vm7, %v164_v39, %v99_v52 }
 0x19b   :  { %v105_v54 = vmul.f32 %v103_v53, %v81_v51 }
 0x19d   :  { %119 = vperm.xlu2 %156, %v105_v54   ;;  %v109_v56 = vmul.f32 %v105_v54, %v69_v24 }
 0x19f   :  { %v111_v57 = vsub.f32 %v107_v55, %v109_v56 }
 0x1a1   :  { %131 = vperm.xlu1 %158, %v111_v57  }
 0x1ef   :  { %v115_v58 = vpop.permute.xlu2 %114 }
 0x1f0   :  { %v122_v59 = vmul.f32 %v115_v58, %v222_v10 }
 0x1f7   :  { %v120_v63 = vpop.permute.xlu2 %119 }
 0x1f8   :  { %v123_v0 = vmul.f32 %v120_v63, %v225_v11 }
 0x20b   :  { %v127_v60 = vpop.permute.xlu0 %126 }
 0x20c   :  { %v134_v61 = vadd.f32 %v127_v60, %v122_v59 }
 0x20e   :  { %v136_v62 = vmax.f32 %v134_v61, 0.0 }
 0x210   :  { %138 = vst [vmem:[%s254_s4] sm:$0xff] %v136_v62 }
 0x213   :  { %v132_v1 = vpop.permute.xlu1 %131 }
 0x214   :  { %v135_v2 = vadd.f32 %v132_v1, %v123_v0 }
 0x216   :  { %v137_v3 = vmax.f32 %v135_v2, 0.0 }
 0x218   :  { %139 = vst [vmem:[%s254_s4 + $0x8] sm:$0xff] %v137_v3 }

// kernel: vqvae_forward.5
= control target key start
LH: loop header
LB: loop body
LE: loop exit
PB: predicated region body
PF: predicated region fallthrough
CT: control target
= control target key end

     0   :  { %s628_s0 = inlined_call_operand.vmem [shape: f32[256,32], index: 0, kind: input, shape index: {}]   ;;  %s629_s1 = inlined_call_operand.vmem [shape: f32[4,256], index: 1, kind: input, shape index: {}]   ;;  %s630_s2 = inlined_call_operand.vmem [shape: f32[4,1], index: 2, kind: input, shape index: {}]   ;;  %s631_s3 = inlined_call_operand.vmem [shape: f32[4,1], index: 3, kind: input, shape index: {}]   ;;  %s632_s4 = inlined_call_operand.vmem [shape: f32[2,4], index: 4, kind: input, shape index: {}]   ;;  %s633_s5 = inlined_call_operand.vmem [shape: f32[2,1], index: 5, kind: input, shape index: {}]   ;;  %s634_s6 = inlined_call_operand.vmem [shape: f32[3,2], index: 6, kind: input, shape index: {}]   ;;  %s635_s7 = inlined_call_operand.vmem [shape: f32[2,3], index: 7, kind: input, shape index: {}]   ;;  %s636_s8 = inlined_call_operand.vmem [shape: f32[3,1], index: 8, kind: input, shape index: {}]   ;;  %s637_s9 = inlined_call_operand.vmem [shape: f32[4,2], index: 9, kind: input, shape index: {}]   ;;  %s638_s10 = inlined_call_operand.vmem [shape: f32[4,1], index: 10, kind: input, shape index: {}]   ;;  %s639_s11 = inlined_call_operand.vmem [shape: f32[4,32], index: 11, kind: output, shape index: {0}]   ;;  %s640_s12 = inlined_call_operand.hbm [shape: f32[1,1], index: 12, kind: output, shape index: {1}]  }
   0x1   :  { %v57_v0 = vld [vmem:[%s628_s0 + $0x78] sm:$0xff]  ;;  %v56_v2 = vld [vmem:[%s628_s0 + $0x70] sm:$0xff]  ;;  %v55_v4 = vld [vmem:[%s628_s0 + $0x68] sm:$0xff] }
   0x2   :  { %v73_v1 = vld [vmem:[%s628_s0 + $0xf8] sm:$0xff]  ;;  %80 = vmatpush.msra.mxu0 %v57_v0  ;;  %v72_v3 = vld [vmem:[%s628_s0 + $0xf0] sm:$0xff]  ;;  %v71_v5 = vld [vmem:[%s628_s0 + $0xe8] sm:$0xff] }
   0x3   :  { %100 = vmatpush.msra.mxu1 %v73_v1  ;;  %v54_v6 = vld [vmem:[%s628_s0 + $0x60] sm:$0xff]  ;;  %v53_v8 = vld [vmem:[%s628_s0 + $0x58] sm:$0xff]  ;;  %v52_v10 = vld [vmem:[%s628_s0 + $0x50] sm:$0xff] }
   0x4   :  { %81 = vmatpush.msra.mxu0 %v56_v2  ;;  %v70_v7 = vld [vmem:[%s628_s0 + $0xe0] sm:$0xff]  ;;  %v69_v9 = vld [vmem:[%s628_s0 + $0xd8] sm:$0xff]  ;;  %v68_v11 = vld [vmem:[%s628_s0 + $0xd0] sm:$0xff] }
   0x5   :  { %101 = vmatpush.msra.mxu1 %v72_v3  ;;  %v51_v12 = vld [vmem:[%s628_s0 + $0x48] sm:$0xff]  ;;  %v41_v14 = vld [vmem:[%s629_s1] sm:$0xff] }
   0x6   :  { %82 = vmatpush.msra.mxu0 %v55_v4  ;;  %v67_v13 = vld [vmem:[%s628_s0 + $0xc8] sm:$0xff]  ;;  %75 = vst [vmem:[#allocation1] ss:$2 sm:$0xff] %v41_v14 }
   0x7   :  { %102 = vmatpush.msra.mxu1 %v71_v5 }
   0x8   :  { %83 = vmatpush.msra.mxu0 %v54_v6 }
   0x9   :  { %103 = vmatpush.msra.mxu1 %v70_v7 }
   0xa   :  { %84 = vmatpush.msra.mxu0 %v53_v8 }
   0xb   :  { %104 = vmatpush.msra.mxu1 %v69_v9 }
   0xc   :  { %85 = vmatpush.msra.mxu0 %v52_v10 }
   0xd   :  { %105 = vmatpush.msra.mxu1 %v68_v11 }
   0xe   :  { %18 = vsyncpa [#allocation3], 0  ;;  %v50_v15 = vld [vmem:[%s628_s0 + $0x40] sm:$0xff]  ;;  %86 = vmatpush.msra.mxu0 %v51_v12  ;;  %v49_v17 = vld [vmem:[%s628_s0 + $0x38] sm:$0xff]  ;;  %vm120_vm0 = vcmask 257024   ;;  %v418_v39 = vmov 32.0  }
   0xf   :  { %v66_v16 = vld [vmem:[%s628_s0 + $0xc0] sm:$0xff]  ;;  %106 = vmatpush.msra.mxu1 %v67_v13  ;;  %v65_v18 = vld [vmem:[%s628_s0 + $0xb8] sm:$0xff]  ;;  %v48_v19 = vld [vmem:[%s628_s0 + $0x30] sm:$0xff]  ;;  %386 = vrcp.f32 %v418_v39  ;;  %v419_v51 = vmov 0   ;;  %vm178_vm5 = vcmask 1043456   ;;  %vm174_vm6 = vcmask 31744  }
  0x10   :  { %87 = vmatpush.msra.mxu0 %v50_v15  ;;  %v64_v20 = vld [vmem:[%s628_s0 + $0xb0] sm:$0xff]  ;;  %v47_v21 = vld [vmem:[%s628_s0 + $0x28] sm:$0xff]  ;;  %v46_v23 = vld [vmem:[%s628_s0 + $0x20] sm:$0xff]  ;;  %383 = vset.pattern.permute.xlu1 %v419_v51  ;;  %vm208_vm7 = vcmask 1041408   ;;  %vm204_vm8 = vcmask 15360   ;;  %vm239_vm9 = vcmask 256000  }
  0x11   :  { %107 = vmatpush.msra.mxu1 %v66_v16  ;;  %v63_v22 = vld [vmem:[%s628_s0 + $0xa8] sm:$0xff]  ;;  %v62_v24 = vld [vmem:[%s628_s0 + $0xa0] sm:$0xff]  ;;  %v45_v25 = vld [vmem:[%s628_s0 + $0x18] sm:$0xff]  ;;  %384 = vset.pattern.permute.xlu2 %v419_v51  ;;  %vm267_vm11 = vcmask 1042432   ;;  %vm263_vm13 = vcmask 23552   ;;  %v420_v39 = vmov 0.0  }
  0x12   :  { %88 = vmatpush.msra.mxu0 %v49_v17  ;;  %v61_v26 = vld [vmem:[%s628_s0 + $0x98] sm:$0xff]  ;;  %v44_v27 = vld [vmem:[%s628_s0 + $0x10] sm:$0xff]  ;;  %v43_v29 = vld [vmem:[%s628_s0 + $0x8] sm:$0xff]  ;;  %385 = vset.pattern.permute.xlu0 %v419_v51  ;;  %vm293_vm14 = vcmask 254976   ;;  %s358_s24 = sshll.u32 %s640_s12, 4  ;;  %s359_s24 = int_to_ptr.hbm [resolvable:$true] %s358_s24 }
  0x13   :  { %108 = vmatpush.msra.mxu1 %v65_v18  ;;  %v60_v28 = vld [vmem:[%s628_s0 + $0x90] sm:$0xff]  ;;  %v59_v30 = vld [vmem:[%s628_s0 + $0x88] sm:$0xff]  ;;  %v42_v31 = vld [vmem:[%s628_s0] sm:$0xff] }
  0x14   :  { %89 = vmatpush.msra.mxu0 %v48_v19  ;;  %v58_v32 = vld [vmem:[%s628_s0 + $0x80] sm:$0xff]  ;;  %v77_v34 = vld.sshfl [vmem:[#allocation1 + $0x8] sm:$0xff pattern:$0x75316420] }
  0x15   :  { %109 = vmatpush.msra.mxu1 %v64_v20  ;;  %v76_v33 = vld.sshfl [vmem:[#allocation1] sm:$0xff pattern:$0x75316420]  ;;  %v387_v40 = vpop.eup %386 }
  0x16   :  { %90 = vmatpush.msra.mxu0 %v47_v21  ;;  %v125_v41 = vmul.f32 32.0, %v387_v40  ;;  %vm129_vm1 = vweird.f32 %v387_v40  ;;  %v138_v60 = vld [vmem:[%s630_s2] sm:$0xf] }
  0x17   :  { %110 = vmatpush.msra.mxu1 %v63_v22  ;;  %v157_v1 = vld [vmem:[%s631_s3] sm:$0xf]  ;;  %v247_v22 = vlaneseq }
  0x18   :  { %91 = vmatpush.msra.mxu0 %v46_v23  ;;  %v126_v42 = vsub.f32 1.0, %v125_v41  ;;  %v316_v3 = vld [vmem:[%s638_s10] sm:$0xf] }
  0x19   :  { %111 = vmatpush.msra.mxu1 %v62_v24  ;;  %v168_v4 = vld [vmem:[%s633_s5] sm:$0x3] }
  0x1a   :  { %92 = vmatpush.msra.mxu0 %v45_v25  ;;  %v127_v43 = vmul.f32 %v387_v40, %v126_v42  ;;  %171 = vperm.xlu2 %384, %v168_v4   ;;  %v202_v5 = vld [vmem:[%s636_s8] sm:$0x7]  ;;  %v248_v25 = vshrl.u32 %v247_v22, 7 }
  0x1b   :  { %112 = vmatpush.msra.mxu1 %v61_v26  ;;  %v167_v11 = vld [vmem:[%s632_s4] sm:$0x3] }
  0x1c   :  { %93 = vmatpush.msra.mxu0 %v44_v27  ;;  %v128_v44 = vadd.f32 %v387_v40, %v127_v43  ;;  %v203_v15 = vld [vmem:[%s634_s6] sm:$0x7] }
  0x1d   :  { %113 = vmatpush.msra.mxu1 %v60_v28  ;;  %v249_v28 = vcvt.s32.f32 %v248_v25  ;;  %v315_v41 = vld [vmem:[%s637_s9] sm:$0xf] }
  0x1e   :  { %94 = vmatpush.msra.mxu0 %v43_v29  ;;  %v130_v45 = vsel %vm129_vm1, %v387_v40, %v128_v44  ;;  %vm313_vm1 = vcmask 0  }
  0x1f   :  { %114 = vmatpush.msra.mxu1 %v59_v30 }
  0x20   :  { %95 = vmatpush.msra.mxu0 %v42_v31 }
  0x21   :  { %115 = vmatpush.msra.mxu1 %v58_v32  ;;  %96 = vmatmul.f32.vlgmr.msra.gmra.mxu0 %v76_v33 }
  0x22   :  { %116 = vmatmul.f32.vlgmr.msra.gmra.mxu1 %v77_v34  ;;  %235 = vperm.xlu2 %384, %v202_v5  }
  0x74   :  { %v172_v12 = vpop.permute.xlu2 %171 }
  0x7c   :  { %v236_v18 = vpop.permute.xlu2 %235 }
  0x9e   :  { %v97_v35 = vpop.f32.mrf.mxu0 }
  0x9f   :  { %v117_v36 = vpop.f32.mrf.mxu1 }
  0xa0   :  { %v118_v37 = vadd.f32 %v117_v36, %v97_v35 }
  0xa2   :  { %v121_v38 = vsel %vm120_vm0, %v118_v37, 0.0 }
  0xa3   :  { %122 = vadd.xlane.f32.xlu0 %v121_v38  ;;  %v262_v38 = vld [vmem:[%s635_s7] sm:$0x3]  ;;  %s422_s7 = smov [#allocation2]  }
  0xa4   :  { %s356_s9 = sshll.u32 %s422_s7, 4  ;;  %s357_s9 = int_to_ptr.vmem [resolvable:$true] %s356_s9 }
 0x116   :  { %v123_v46 = vpop.xlane.xlu0 %122 }
 0x117   :  { %v131_v47 = vmul.f32 %v130_v45, %v123_v46  ;;  %v421_v46 = vmov 64.0  }
 0x119   :  { %v132_v48 = vsub.f32 %v118_v37, %v131_v47 }
 0x11b   :  { %v133_v49 = vmul.f32 %v132_v48, %v132_v48 }
 0x11d   :  { %v134_v50 = vsel %vm120_vm0, %v133_v49, 0.0 }
 0x11e   :  { %135 = vadd.xlane.f32.xlu0 %v134_v50 }
 0x191   :  { %v136_v52 = vpop.xlane.xlu0 %135 }
 0x192   :  { %v137_v53 = vmul.f32 %v136_v52, %v130_v45 }
 0x194   :  { %v139_v54 = vadd.f32 1e-05, %v137_v53 }
 0x196   :  { %388 = vrsqrt.f32 %v139_v54  ;;  %vm146_vm3 = vweird.f32 %v139_v54 }
 0x197   :  { %390 = vrcp.f32 %v421_v46 }
 0x19c   :  { %v389_v55 = vpop.eup %388 }
 0x19d   :  { %v141_v56 = vmul.f32 %v389_v55, %v139_v54  ;;  %vm147_vm2 = vweird.f32 %v389_v55 }
 0x19e   :  { %vm148_vm4 = vmor %vm146_vm3, %vm147_vm2 }
 0x19f   :  { %v142_v57 = vmul.f32 %v389_v55, %v141_v56 }
 0x1a1   :  { %v143_v58 = vmul.f32 0.5, %v142_v57 }
 0x1a3   :  { %v144_v59 = vsub.f32 1.5, %v143_v58 }
 0x1a5   :  { %v145_v61 = vmul.f32 %v389_v55, %v144_v59 }
 0x1a7   :  { %v149_v62 = vsel %vm148_vm4, %v389_v55, %v145_v61 }
 0x1a8   :  { %v150_v63 = vmul.f32 %v149_v62, %v138_v60 }
 0x1aa   :  { %153 = vperm.xlu1 %383, %v150_v63   ;;  %v158_v0 = vmul.f32 %v150_v63, %v131_v47  ;;  %v391_v47 = vpop.eup %390 }
 0x1ab   :  { %v306_v48 = vmul.f32 64.0, %v391_v47  ;;  %vm310_vm15 = vweird.f32 %v391_v47 }
 0x1ac   :  { %v159_v2 = vsub.f32 %v157_v1, %v158_v0 }
 0x1ad   :  { %v307_v51 = vsub.f32 1.0, %v306_v48 }
 0x1af   :  { %v308_v54 = vmul.f32 %v391_v47, %v307_v51 }
 0x1b1   :  { %v309_v57 = vadd.f32 %v391_v47, %v308_v54 }
 0x1b2   :  { %162 = vperm.xlu1 %383, %v159_v2  }
 0x1b3   :  { %v311_v63 = vsel %vm310_vm15, %v391_v47, %v309_v57 }
 0x1ba   :  { %319 = vperm.xlu1 %383, %v316_v3  }
 0x21c   :  { %v154_v6 = vpop.permute.xlu1 %153 }
 0x21d   :  { %v156_v7 = vmul.f32 %v154_v6, %v118_v37 }
 0x224   :  { %v163_v8 = vpop.permute.xlu1 %162 }
 0x225   :  { %v165_v9 = vadd.f32 %v163_v8, %v156_v7 }
 0x227   :  { %v166_v10 = vmax.f32 %v165_v9, 0.0 }
 0x229   :  { %369 = vmatpush.msk.msra.mxu2 %vm178_vm5, %v166_v10 }
 0x22a   :  { %370 = vmatmul.msk.f32.vlgmr.msra.gmra.mxu2 %vm174_vm6, %v167_v11 }
 0x22c   :  { %v320_v59 = vpop.permute.xlu1 %319 }
 0x2ad   :  { %v199_v13 = vpop.f32.mrf.mxu2 }
 0x2ae   :  { %v200_v14 = vadd.f32 %v199_v13, %v172_v12 }
 0x2b0   :  { %371 = vmatpush.msk.msra.mxu3 %vm208_vm7, %v200_v14 }
 0x2b1   :  { %372 = vmatmul.msk.f32.vlgmr.msra.gmra.mxu3 %vm204_vm8, %v203_v15 }
 0x334   :  { %v229_v16 = vpop.f32.mrf.mxu3 }
 0x335   :  { %v232_v17 = vmul.f32 2.0, %v229_v16 }
 0x337   :  { %v238_v19 = vsub.f32 %v236_v18, %v232_v17 }
 0x339   :  { %v240_v20 = vsel %vm239_vm9, %v238_v19, inf }
 0x33a   :  { %v241_v21 = vrot.slane %v240_v20, 4 }
 0x33c   :  { %v242_v23 = vmin.f32 %v240_v20, %v241_v21 }
 0x33e   :  { %v243_v24 = vrot.slane %v242_v23, 2 }
 0x340   :  { %v244_v26 = vmin.f32 %v242_v23, %v243_v24 }
 0x342   :  { %v245_v27 = vrot.slane %v244_v26, 1 }
 0x344   :  { %v246_v29 = vmin.f32 %v244_v26, %v245_v27 }
 0x346   :  { %vm250_vm10 = vcmp.eq.f32.partialorder %v238_v19, %v246_v29 }
 0x347   :  { %v251_v30 = vsel %vm250_vm10, %v249_v28, 3.0 }
 0x348   :  { %v252_v31 = vsel %vm239_vm9, %v251_v30, inf }
 0x349   :  { %v253_v32 = vrot.slane %v252_v31, 4 }
 0x34b   :  { %v254_v33 = vmin.f32 %v252_v31, %v253_v32 }
 0x34d   :  { %v255_v34 = vrot.slane %v254_v33, 2 }
 0x34f   :  { %v256_v35 = vmin.f32 %v254_v33, %v255_v34 }
 0x351   :  { %v257_v36 = vrot.slane %v256_v35, 1 }
 0x353   :  { %v258_v37 = vmin.f32 %v256_v35, %v257_v36 }
 0x355   :  { %vm259_vm12 = vcmp.eq.f32.partialorder %v249_v28, %v258_v37 }
 0x356   :  { %v373_v40 = vsel %vm259_vm12, 1.0, %v420_v39 }
 0x357   :  { %374 = vmatpush.msk.msrb.mxu2 %vm267_vm11, %v373_v40 }
 0x358   :  { %375 = vmatmul.msk.f32.vlgmr.msrb.gmra.mxu2 %vm263_vm13, %v262_v38 }
 0x3db   :  { %v288_v42 = vpop.f32.mrf.mxu2 }
 0x3dc   :  { %v291_v43 = vsub.f32 %v288_v42, %v200_v14  ;;  %376 = vmatpush.msk.msrb.mxu3 %vm208_vm7, %v288_v42 }
 0x3dd   :  { %377 = vmatmul.msk.f32.vlgmr.msrb.gmra.mxu3 %vm204_vm8, %v315_v41 }
 0x3de   :  { %v292_v44 = vmul.f32 %v291_v43, %v291_v43 }
 0x3e0   :  { %v294_v45 = vsel %vm293_vm14, %v292_v44, 0.0 }
 0x3e1   :  { %295 = vadd.xlane.f32.xlu0 %v294_v45 }
 0x454   :  { %v296_v49 = vpop.xlane.xlu0 %295 }
 0x455   :  { %v297_v50 = vsel %vm208_vm7, %v296_v49, 0.0 }
 0x456   :  { %v298_v52 = vrot.slane %v297_v50, 4 }
 0x458   :  { %v299_v53 = vadd.f32 %v298_v52, %v297_v50 }
 0x45a   :  { %v300_v55 = vrot.slane %v299_v53, 2 }
 0x45c   :  { %v301_v56 = vadd.f32 %v300_v55, %v299_v53 }
 0x45e   :  { %v302_v58 = vrot.slane %v301_v56, 1 }
 0x460   :  { %v303_v60 = vadd.f32 %v302_v58, %v301_v56  ;;  %v345_v61 = vpop.f32.mrf.mxu3 }
 0x461   :  { %v346_v62 = vadd.f32 %v345_v61, %v320_v59 }
 0x462   :  { %v304_v0 = vmul.f32 1.2, %v303_v60 }
 0x463   :  { %348 = vst.msk [vmem:[%s639_s11] sm:$0xf] %vm120_vm0, %v346_v62 }
 0x464   :  { %v312_v1 = vmul.f32 %v311_v63, %v304_v0 }
 0x466   :  { %314 = vst.msk [vmem:[#allocation2] sm:$0x1] %vm313_vm1, %v312_v1 }
 0x467   :  { %361 = dma.vmem_to_hbm [thread:$0]  %s357_s9, 16, %s359_s24, [#allocation3]  }
 0x468   :  { %416 = dma.done.wait [#allocation3], 16  }
 0x469   :  { %417 = vsyncadd [#allocation3], 4294967280 }
 0x46a   :  { %368 = vsyncpa [#allocation3], 1 }

// kernel: vqvae_forward.6
= control target key start
LH: loop header
LB: loop body
LE: loop exit
PB: predicated region body
PF: predicated region fallthrough
CT: control target
= control target key end

     0   :  { %vm21_vm0 = vcmask 130048   ;;  %s310_s20 = smov 32   ;;  %s311_s21 = smov 64   ;;  %vm180_vm1 = vcmask 261120   ;;  %vm183_vm2 = vcmask 523264   ;;  %vm186_vm3 = vcmask 785408   ;;  %s424_s0 = inlined_call_operand.vmem [shape: f32[4,16,32], index: 0, kind: input, shape index: {}]   ;;  %s425_s1 = inlined_call_operand.vmem [shape: f32[4,16,16], index: 1, kind: input, shape index: {}]   ;;  %s426_s2 = inlined_call_operand.vmem [shape: f32[16,1], index: 2, kind: input, shape index: {}]   ;;  %s427_s3 = inlined_call_operand.vmem [shape: f32[16,1], index: 3, kind: input, shape index: {}]   ;;  %s428_s4 = inlined_call_operand.vmem [shape: f32[16,128], index: 4, kind: output, shape index: {}]  }
   0x1   :  { %v287_v0 = vld [vmem:[%s424_s0 + $0x28] sm:$0xff]  ;;  %v286_v1 = vld [vmem:[%s424_s0 + $0x20] sm:$0xff]  ;;  %v281_v3 = vld [vmem:[%s424_s0 + $0x18] sm:$0xff]  ;;  %s312_s22 = smov 96   ;;  %v313_v36 = vmov 128.0   ;;  %v314_v51 = vmov 0  }
   0x2   :  { %112 = vmatpush.msra.mxu2 %v287_v0  ;;  %v284_v2 = vld [vmem:[%s425_s1 + $0x20] sm:$0xff]  ;;  %v280_v4 = vld [vmem:[%s424_s0 + $0x10] sm:$0xff]  ;;  %77 = vmatpush.msra.mxu1 %v281_v3  ;;  %v293_v6 = vld [vmem:[%s424_s0 + $0x38] sm:$0xff]  ;;  %304 = vrcp.f32 %v313_v36 }
   0x3   :  { %v278_v5 = vld [vmem:[%s425_s1 + $0x10] sm:$0xff]  ;;  %147 = vmatpush.msra.mxu3 %v293_v6  ;;  %v20_v9 = vld [vmem:[%s424_s0 + $0x8] sm:$0xff]  ;;  %v19_v10 = vld [vmem:[%s424_s0] sm:$0xff]  ;;  %301 = vset.pattern.permute.xlu0 %v314_v51 }
   0x4   :  { %113 = vmatpush.msra.mxu2 %v286_v1  ;;  %v292_v7 = vld [vmem:[%s424_s0 + $0x30] sm:$0xff]  ;;  %78 = vmatpush.msra.mxu1 %v280_v4  ;;  %v17_v11 = vld [vmem:[%s425_s1] sm:$0xff]  ;;  %v285_v12 = vld [vmem:[%s425_s1 + $0x28] sm:$0xff] }
   0x5   :  { %v290_v8 = vld [vmem:[%s425_s1 + $0x30] sm:$0xff]  ;;  %288 = vmatmul.msk.f32.vlgmr.msra.gmra.mxu2 %vm21_vm0, %v284_v2  ;;  %282 = vmatmul.msk.f32.vlgmr.msra.gmra.mxu1 %vm21_vm0, %v278_v5  ;;  %v279_v13 = vld [vmem:[%s425_s1 + $0x18] sm:$0xff]  ;;  %v18_v15 = vld [vmem:[%s425_s1 + $0x8] sm:$0xff] }
   0x6   :  { %148 = vmatpush.msra.mxu3 %v292_v7  ;;  %42 = vmatpush.msra.mxu0 %v20_v9  ;;  %v291_v14 = vld [vmem:[%s425_s1 + $0x38] sm:$0xff]  ;;  %v212_v1 = vld [vmem:[%s426_s2] sm:$0xff] }
   0x7   :  { %294 = vmatmul.msk.f32.vlgmr.msra.gmra.mxu3 %vm21_vm0, %v290_v8  ;;  %303 = vset.pattern.permute.xlu2 %v314_v51  ;;  %v250_v7 = vld [vmem:[%s427_s3] sm:$0xff] }
   0x8   :  { %43 = vmatpush.msra.mxu0 %v19_v10  ;;  %v305_v37 = vpop.eup %304  ;;  %302 = vset.pattern.permute.xlu1 %v314_v51 }
   0x9   :  { %276 = vmatmul.msk.f32.vlgmr.msra.gmra.mxu0 %vm21_vm0, %v17_v11  ;;  %v194_v38 = vmul.f32 128.0, %v305_v37  ;;  %vm198_vm4 = vweird.f32 %v305_v37  ;;  %v213_v11 = vld [vmem:[%s426_s2 + $0x8] sm:$0xff] }
   0xb   :  { %v195_v39 = vsub.f32 1.0, %v194_v38 }
   0xd   :  { %289 = vmatmul.msk.f32.gmra.mxu2 %vm21_vm0, %v285_v12  ;;  %283 = vmatmul.msk.f32.gmra.mxu1 %vm21_vm0, %v279_v13  ;;  %v196_v40 = vmul.f32 %v305_v37, %v195_v39 }
   0xf   :  { %295 = vmatmul.msk.f32.gmra.mxu3 %vm21_vm0, %v291_v14  ;;  %v197_v41 = vadd.f32 %v305_v37, %v196_v40 }
  0x11   :  { %277 = vmatmul.msk.f32.gmra.mxu0 %vm21_vm0, %v18_v15  ;;  %v199_v42 = vsel %vm198_vm4, %v305_v37, %v197_v41 }
  0x82   :  { %v80_v16 = vpop.f32.mrf.mxu1 }
  0x83   :  { %158 = vrot.lane.b32.xlu0 %v80_v16, %s310_s20  ;;  %v251_v16 = vld [vmem:[%s427_s3 + $0x8] sm:$0xff] }
  0x86   :  { %v45_v22 = vpop.f32.mrf.mxu0 }
  0x88   :  { %v115_v17 = vpop.f32.mrf.mxu2 }
  0x89   :  { %166 = vrot.lane.b32.xlu1 %v115_v17, %s311_s21 }
  0x8a   :  { %v150_v18 = vpop.f32.mrf.mxu3  ;;  %v83_v19 = vpop.f32.mrf.mxu1 }
  0x8b   :  { %174 = vrot.lane.b32.xlu2 %v150_v18, %s312_s22  ;;  %160 = vrot.lane.b32.xlu0 %v83_v19, %s310_s20 }
  0x8e   :  { %v48_v30 = vpop.f32.mrf.mxu0 }
  0x90   :  { %v118_v20 = vpop.f32.mrf.mxu2 }
  0x91   :  { %168 = vrot.lane.b32.xlu1 %v118_v20, %s311_s21 }
  0x92   :  { %v153_v21 = vpop.f32.mrf.mxu3 }
  0x93   :  { %176 = vrot.lane.b32.xlu2 %v153_v21, %s312_s22 }
  0xe5   :  { %v175_v24 = vpop.permute.xlu2 %174 }
  0xed   :  { %v177_v32 = vpop.permute.xlu2 %176 }
  0xf5   :  { %v159_v23 = vpop.permute.xlu0 %158 }
  0xf6   :  { %v181_v25 = vsel %vm180_vm1, %v45_v22, %v159_v23 }
  0xfb   :  { %v167_v26 = vpop.permute.xlu1 %166 }
  0xfc   :  { %v184_v27 = vsel %vm183_vm2, %v181_v25, %v167_v26 }
  0xfd   :  { %v396_v28 = vsel %vm186_vm3, %v184_v27, %v175_v24  ;;  %v161_v29 = vpop.permute.xlu0 %160 }
  0xfe   :  { %189 = vadd.xlane.f32.xlu0 %v396_v28  ;;  %v182_v31 = vsel %vm180_vm1, %v48_v30, %v161_v29 }
 0x103   :  { %v169_v33 = vpop.permute.xlu1 %168 }
 0x104   :  { %v185_v34 = vsel %vm183_vm2, %v182_v31, %v169_v33 }
 0x105   :  { %v399_v35 = vsel %vm186_vm3, %v185_v34, %v177_v32 }
 0x106   :  { %191 = vadd.xlane.f32.xlu1 %v399_v35 }
 0x171   :  { %v190_v43 = vpop.xlane.xlu0 %189 }
 0x172   :  { %v200_v44 = vmul.f32 %v199_v42, %v190_v43 }
 0x174   :  { %v202_v45 = vsub.f32 %v396_v28, %v200_v44 }
 0x176   :  { %v204_v46 = vmul.f32 %v202_v45, %v202_v45 }
 0x178   :  { %206 = vadd.xlane.f32.xlu2 %v204_v46 }
 0x179   :  { %v192_v47 = vpop.xlane.xlu1 %191 }
 0x17a   :  { %v201_v48 = vmul.f32 %v199_v42, %v192_v47 }
 0x17c   :  { %v203_v49 = vsub.f32 %v399_v35, %v201_v48 }
 0x17e   :  { %v205_v50 = vmul.f32 %v203_v49, %v203_v49 }
 0x180   :  { %208 = vadd.xlane.f32.xlu2 %v205_v50 }
 0x1eb   :  { %v207_v52 = vpop.xlane.xlu2 %206 }
 0x1ec   :  { %v210_v53 = vmul.f32 %v207_v52, %v199_v42 }
 0x1ee   :  { %v214_v54 = vadd.f32 1e-05, %v210_v53 }
 0x1f0   :  { %306 = vrsqrt.f32 %v214_v54  ;;  %vm222_vm6 = vweird.f32 %v214_v54 }
 0x1f3   :  { %v209_v55 = vpop.xlane.xlu2 %208 }
 0x1f4   :  { %v211_v56 = vmul.f32 %v209_v55, %v199_v42 }
 0x1f6   :  { %v307_v57 = vpop.eup %306  ;;  %v215_v58 = vadd.f32 1e-05, %v211_v56 }
 0x1f7   :  { %v217_v59 = vmul.f32 %v307_v57, %v214_v54  ;;  %vm223_vm5 = vweird.f32 %v307_v57 }
 0x1f8   :  { %308 = vrsqrt.f32 %v215_v58  ;;  %vm224_vm7 = vmor %vm222_vm6, %vm223_vm5  ;;  %vm232_vm9 = vweird.f32 %v215_v58 }
 0x1f9   :  { %v218_v60 = vmul.f32 %v307_v57, %v217_v59 }
 0x1fb   :  { %v219_v61 = vmul.f32 0.5, %v218_v60 }
 0x1fd   :  { %v220_v62 = vsub.f32 1.5, %v219_v61 }
 0x1fe   :  { %v309_v63 = vpop.eup %308 }
 0x1ff   :  { %v227_v0 = vmul.f32 %v309_v63, %v215_v58  ;;  %v221_v2 = vmul.f32 %v307_v57, %v220_v62  ;;  %vm233_vm8 = vweird.f32 %v309_v63 }
 0x200   :  { %vm234_vm10 = vmor %vm232_vm9, %vm233_vm8 }
 0x201   :  { %v228_v3 = vmul.f32 %v309_v63, %v227_v0  ;;  %v225_v4 = vsel %vm224_vm7, %v307_v57, %v221_v2 }
 0x202   :  { %v236_v5 = vmul.f32 %v225_v4, %v212_v1 }
 0x203   :  { %v229_v6 = vmul.f32 0.5, %v228_v3 }
 0x204   :  { %240 = vperm.xlu0 %301, %v236_v5   ;;  %v252_v8 = vmul.f32 %v236_v5, %v200_v44 }
 0x205   :  { %v230_v9 = vsub.f32 1.5, %v229_v6 }
 0x206   :  { %v254_v10 = vsub.f32 %v250_v7, %v252_v8 }
 0x207   :  { %v231_v12 = vmul.f32 %v309_v63, %v230_v9 }
 0x208   :  { %258 = vperm.xlu2 %303, %v254_v10  }
 0x209   :  { %v235_v13 = vsel %vm234_vm10, %v309_v63, %v231_v12 }
 0x20a   :  { %v237_v14 = vmul.f32 %v235_v13, %v213_v11 }
 0x20c   :  { %245 = vperm.xlu1 %302, %v237_v14   ;;  %v253_v15 = vmul.f32 %v237_v14, %v201_v48 }
 0x20e   :  { %v255_v17 = vsub.f32 %v251_v16, %v253_v15 }
 0x214   :  { %263 = vperm.xlu1 %302, %v255_v17  }
 0x262   :  { %v259_v20 = vpop.permute.xlu2 %258 }
 0x276   :  { %v241_v18 = vpop.permute.xlu0 %240 }
 0x277   :  { %v248_v19 = vmul.f32 %v241_v18, %v396_v28 }
 0x279   :  { %v266_v21 = vadd.f32 %v259_v20, %v248_v19 }
 0x27b   :  { %v268_v22 = vmax.f32 %v266_v21, 0.0 }
 0x27d   :  { %270 = vst [vmem:[%s428_s4] sm:$0xff] %v268_v22 }
 0x27e   :  { %v246_v23 = vpop.permute.xlu1 %245 }
 0x27f   :  { %v249_v24 = vmul.f32 %v246_v23, %v399_v35 }
 0x286   :  { %v264_v25 = vpop.permute.xlu1 %263 }
 0x287   :  { %v267_v26 = vadd.f32 %v264_v25, %v249_v24 }
 0x289   :  { %v269_v27 = vmax.f32 %v267_v26, 0.0 }
 0x28b   :  { %271 = vst [vmem:[%s428_s4 + $0x8] sm:$0xff] %v269_v27 }

// kernel: vqvae_forward.7
= control target key start
LH: loop header
LB: loop body
LE: loop exit
PB: predicated region body
PF: predicated region fallthrough
CT: control target
= control target key end

     0   :  { %v221_v3 = vmov 0   ;;  %vm23_vm0 = vcmask 523264   ;;  %vm169_vm1 = vcmask 1043456   ;;  %s363_s0 = inlined_call_operand.vmem [shape: f32[4,64,128], index: 0, kind: input, shape index: {}]   ;;  %s364_s1 = inlined_call_operand.vmem [shape: f32[4,4,64], index: 1, kind: input, shape index: {}]   ;;  %s365_s2 = inlined_call_operand.vmem [shape: f32[4,1], index: 2, kind: input, shape index: {}]   ;;  %s366_s3 = inlined_call_operand.vmem [shape: f32[4,512], index: 3, kind: output, shape index: {}]  }
   0x1   :  { %v199_v0 = vld [vmem:[%s363_s0 + $0xb8] sm:$0xff]  ;;  %v198_v2 = vld [vmem:[%s363_s0 + $0xb0] sm:$0xff]  ;;  %212 = vset.pattern.permute.xlu0 %v221_v3  ;;  %v197_v6 = vld [vmem:[%s363_s0 + $0xa8] sm:$0xff] }
   0x2   :  { %v209_v1 = vld [vmem:[%s363_s0 + $0xf8] sm:$0xff]  ;;  %103 = vmatpush.msra.mxu2 %v199_v0  ;;  %v208_v4 = vld [vmem:[%s363_s0 + $0xf0] sm:$0xff]  ;;  %v207_v7 = vld [vmem:[%s363_s0 + $0xe8] sm:$0xff] }
   0x3   :  { %137 = vmatpush.msra.mxu3 %v209_v1  ;;  %v189_v5 = vld [vmem:[%s363_s0 + $0x78] sm:$0xff]  ;;  %v188_v9 = vld [vmem:[%s363_s0 + $0x70] sm:$0xff]  ;;  %v196_v11 = vld [vmem:[%s363_s0 + $0xa0] sm:$0xff] }
   0x4   :  { %69 = vmatpush.msra.mxu1 %v189_v5  ;;  %v22_v8 = vld [vmem:[%s363_s0 + $0x38] sm:$0xff]  ;;  %104 = vmatpush.msra.mxu2 %v198_v2  ;;  %v21_v10 = vld [vmem:[%s363_s0 + $0x30] sm:$0xff]  ;;  %v206_v12 = vld [vmem:[%s363_s0 + $0xe0] sm:$0xff] }
   0x5   :  { %138 = vmatpush.msra.mxu3 %v208_v4  ;;  %35 = vmatpush.msra.mxu0 %v22_v8  ;;  %v187_v13 = vld [vmem:[%s363_s0 + $0x68] sm:$0xff]  ;;  %v186_v15 = vld [vmem:[%s363_s0 + $0x60] sm:$0xff]  ;;  %v195_v16 = vld [vmem:[%s363_s0 + $0x98] sm:$0xff] }
   0x6   :  { %70 = vmatpush.msra.mxu1 %v188_v9  ;;  %105 = vmatpush.msra.mxu2 %v197_v6  ;;  %v20_v14 = vld [vmem:[%s363_s0 + $0x28] sm:$0xff]  ;;  %v205_v17 = vld [vmem:[%s363_s0 + $0xd8] sm:$0xff]  ;;  %v19_v18 = vld [vmem:[%s363_s0 + $0x20] sm:$0xff] }
   0x7   :  { %139 = vmatpush.msra.mxu3 %v207_v7  ;;  %36 = vmatpush.msra.mxu0 %v21_v10  ;;  %v185_v19 = vld [vmem:[%s363_s0 + $0x58] sm:$0xff]  ;;  %v194_v20 = vld [vmem:[%s363_s0 + $0x90] sm:$0xff]  ;;  %v193_v24 = vld [vmem:[%s363_s0 + $0x88] sm:$0xff] }
   0x8   :  { %71 = vmatpush.msra.mxu1 %v187_v13  ;;  %106 = vmatpush.msra.mxu2 %v196_v11  ;;  %v204_v21 = vld [vmem:[%s363_s0 + $0xd0] sm:$0xff]  ;;  %v18_v22 = vld [vmem:[%s363_s0 + $0x18] sm:$0xff]  ;;  %v203_v25 = vld [vmem:[%s363_s0 + $0xc8] sm:$0xff] }
   0x9   :  { %140 = vmatpush.msra.mxu3 %v206_v12  ;;  %37 = vmatpush.msra.mxu0 %v20_v14  ;;  %v184_v23 = vld [vmem:[%s363_s0 + $0x50] sm:$0xff]  ;;  %v183_v27 = vld [vmem:[%s363_s0 + $0x48] sm:$0xff]  ;;  %v192_v28 = vld [vmem:[%s363_s0 + $0x80] sm:$0xff] }
   0xa   :  { %72 = vmatpush.msra.mxu1 %v186_v15  ;;  %107 = vmatpush.msra.mxu2 %v195_v16  ;;  %v17_v26 = vld [vmem:[%s363_s0 + $0x10] sm:$0xff]  ;;  %v202_v29 = vld [vmem:[%s363_s0 + $0xc0] sm:$0xff]  ;;  %v191_v30 = vld [vmem:[%s364_s1 + $0x8] sm:$0xf] }
   0xb   :  { %141 = vmatpush.msra.mxu3 %v205_v17  ;;  %38 = vmatpush.msra.mxu0 %v19_v18  ;;  %v201_v31 = vld [vmem:[%s364_s1 + $0xc] sm:$0xf]  ;;  %v182_v33 = vld [vmem:[%s363_s0 + $0x40] sm:$0xff] }
   0xc   :  { %73 = vmatpush.msra.mxu1 %v185_v19  ;;  %108 = vmatpush.msra.mxu2 %v194_v20  ;;  %v16_v32 = vld [vmem:[%s363_s0 + $0x8] sm:$0xff]  ;;  %v181_v34 = vld [vmem:[%s364_s1 + $0x4] sm:$0xf]  ;;  %v149_v35 = vld [vmem:[%s365_s2] sm:$0xf] }
   0xd   :  { %142 = vmatpush.msra.mxu3 %v204_v21  ;;  %39 = vmatpush.msra.mxu0 %v18_v22  ;;  %v15_v36 = vld [vmem:[%s363_s0] sm:$0xff] }
   0xe   :  { %74 = vmatpush.msra.mxu1 %v184_v23  ;;  %109 = vmatpush.msra.mxu2 %v193_v24  ;;  %v14_v37 = vld [vmem:[%s364_s1] sm:$0xf] }
   0xf   :  { %143 = vmatpush.msra.mxu3 %v203_v25  ;;  %40 = vmatpush.msra.mxu0 %v17_v26 }
  0x10   :  { %75 = vmatpush.msra.mxu1 %v183_v27  ;;  %110 = vmatpush.msra.mxu2 %v192_v28 }
  0x11   :  { %144 = vmatpush.msra.mxu3 %v202_v29  ;;  %200 = vmatmul.msk.f32.vlgmr.msra.gmra.mxu2 %vm23_vm0, %v191_v30 }
  0x12   :  { %210 = vmatmul.msk.f32.vlgmr.msra.gmra.mxu3 %vm23_vm0, %v201_v31  ;;  %41 = vmatpush.msra.mxu0 %v16_v32 }
  0x13   :  { %76 = vmatpush.msra.mxu1 %v182_v33  ;;  %152 = vperm.xlu0 %212, %v149_v35  }
  0x14   :  { %190 = vmatmul.msk.f32.vlgmr.msra.gmra.mxu1 %vm23_vm0, %v181_v34  ;;  %42 = vmatpush.msra.mxu0 %v15_v36 }
  0x15   :  { %180 = vmatmul.msk.f32.vlgmr.msra.gmra.mxu0 %vm23_vm0, %v14_v37 }
  0x85   :  { %v153_v38 = vpop.permute.xlu0 %152 }
  0x91   :  { %v78_v39 = vpop.f32.mrf.mxu1 }
  0x92   :  { %v156_v40 = vadd.f32 %v153_v38, %v78_v39  ;;  %v44_v41 = vpop.f32.mrf.mxu0 }
  0x93   :  { %v155_v42 = vadd.f32 %v153_v38, %v44_v41 }
  0x94   :  { %213 = vtanh.f32 %v156_v40  ;;  %v112_v43 = vpop.f32.mrf.mxu2 }
  0x95   :  { %v146_v44 = vpop.f32.mrf.mxu3  ;;  %215 = vtanh.f32 %v155_v42  ;;  %v157_v46 = vadd.f32 %v153_v38, %v112_v43 }
  0x96   :  { %v158_v45 = vadd.f32 %v153_v38, %v146_v44 }
  0x98   :  { %217 = vtanh.f32 %v158_v45 }
  0x99   :  { %219 = vtanh.f32 %v157_v46 }
  0x9a   :  { %v214_v47 = vpop.eup %213 }
  0x9b   :  { %v167_v48 = vrot.slane %v214_v47, 4  ;;  %v216_v49 = vpop.eup %215 }
  0x9d   :  { %v170_v50 = vsel %vm169_vm1, %v216_v49, %v167_v48 }
  0x9e   :  { %174 = vst [vmem:[%s366_s3] sm:$0xff] %v170_v50  ;;  %v218_v51 = vpop.eup %217 }
  0x9f   :  { %v168_v52 = vrot.slane %v218_v51, 4  ;;  %v220_v53 = vpop.eup %219 }
  0xa1   :  { %v171_v54 = vsel %vm169_vm1, %v220_v53, %v168_v52 }
  0xa2   :  { %175 = vst [vmem:[%s366_s3 + $0x8] sm:$0xff] %v171_v54 }

</bundles_post_ra>
